<compile_context>
chip_gen: v5e
topology: v5e:2x2
jax: 0.10.0
libtpu: 0.0.40
codegen_flags: <defaults>
</compile_context>

<pallas_src>
import functools

import jax
import jax.numpy as jnp
from jax import lax
from jax.experimental import pallas as pl
from jax.experimental.pallas import tpu as pltpu


def _edmonds_sampler_kernel(len_ref, logits_ref, u_ref,
                            z_ref, arb_ref, stats_ref):
    g = pl.program_id(0)
    TB, Np, _ = logits_ref.shape

    # ---- u = clamp_probs(uniform) ------------------------------------------
    eps = jnp.float32(jnp.finfo(jnp.float32).eps)
    u = jnp.clip(u_ref[...], eps, jnp.float32(1.0) - eps)

    # ---- z = to_z(logits, u) = logits + Gumbel(u) --------------------------
    z = logits_ref[...] + (-jnp.log(-jnp.log(u)))           # (TB, Np, Np)
    z_ref[...] = z

    # ---- per-sentence lengths for the TB sentences in this block -----------
    base = g * TB
    Ls = jnp.concatenate(
        [jnp.full((1, 1, Np), len_ref[base + t], dtype=jnp.int32)
         for t in range(TB)],
        axis=0)                                              # (TB, 1, Np)

    row = lax.broadcasted_iota(jnp.int32, (TB, Np, Np), 1)   # head index
    col = lax.broadcasted_iota(jnp.int32, (TB, Np, Np), 2)   # modifier index
    valid = (row < Ls) & (col < Ls) & (row != col) & (col >= 1)

    # ---- greedy best incoming arc per modifier (phase 1 of Edmonds) --------
    NEG = jnp.float32(-1e30)
    zm = jnp.where(valid, z, NEG)
    best = jnp.max(zm, axis=1, keepdims=True)                # (TB, 1, Np)

    # Exactly one head per modifier: lowest head index among tied maxima
    # (fixes tie double-counting of the previous >=-mask version).
    cand = jnp.where(zm >= best, row, jnp.int32(Np))
    first = jnp.min(cand, axis=1, keepdims=True)             # (TB, 1, Np)
    sel = (row == first) & valid
    arb_ref[...] = jnp.where(sel, 1.0, 0.0).astype(arb_ref.dtype)

    # ---- stats straight from `best`: no second reduction, no N^2 multiply --
    has_head = best > (NEG * jnp.float32(0.5))               # column has a valid head
    stats_ref[...] = jnp.where(has_head, best, jnp.float32(0.0))


def _pick_batch_tile(batch, n_pad, target_bytes=1 << 20, max_tile=16):
    """Largest divisor of `batch` whose (tile, n_pad, n_pad) f32 block stays
    around target_bytes (and <= max_tile to keep the length unroll short)."""
    cap = max(1, target_bytes // (4 * n_pad * n_pad))
    cap = min(cap, batch, max_tile)
    tile = 1
    for d in range(1, cap + 1):
        if batch % d == 0:
            tile = d
    return tile


@functools.partial(jax.jit, static_argnames=("arb_dtype",))
def edmonds_sampler(logits, lengths, key, arb_dtype=jnp.float32):
    """Returns (arb, stats, z), matching EdmondsSampler.forward ordering."""
    B, N, N2 = logits.shape
    assert N == N2, "logits must be [B, N, N]"

    # Pad the arc matrix to a multiple of 128 so every load/store is
    # lane-dense (padded rows/cols are masked out via `lengths`).
    n_pad = ((N + 127) // 128) * 128
    tb = _pick_batch_tile(B, n_pad)          # several sentences per grid step
    grid = (B // tb,)

    lengths = lengths.astype(jnp.int32)
    logits_p = logits.astype(jnp.float32)
    if n_pad != N:
        logits_p = jnp.pad(logits_p, ((0, 0), (0, n_pad - N), (0, n_pad - N)))
    u = jax.random.uniform(key, (B, n_pad, n_pad), dtype=jnp.float32)

    blk = lambda g, lens: (g, 0, 0)
    grid_spec = pltpu.PrefetchScalarGridSpec(
        num_scalar_prefetch=1,               # lengths -> SMEM
        grid=grid,
        in_specs=[
            pl.BlockSpec((tb, n_pad, n_pad), blk),   # logits
            pl.BlockSpec((tb, n_pad, n_pad), blk),   # u
        ],
        out_specs=[
            pl.BlockSpec((tb, n_pad, n_pad), blk),   # z
            pl.BlockSpec((tb, n_pad, n_pad), blk),   # arb
            pl.BlockSpec((tb, 1, n_pad), blk),       # stats
        ],
    )

    # Double-buffered VMEM need: 3 f32 big blocks (logits, u, z) + arb + stats.
    arb_bytes = jnp.dtype(arb_dtype).itemsize
    vmem_need = 2 * (tb * n_pad * n_pad * (3 * 4 + arb_bytes) + tb * n_pad * 4)
    vmem_limit = int(min(max(vmem_need * 5 // 4, 32 * 1024 * 1024),
                         120 * 1024 * 1024))

    z, arb, stats = pl.pallas_call(
        _edmonds_sampler_kernel,
        grid_spec=grid_spec,
        out_shape=(
            jax.ShapeDtypeStruct((B, n_pad, n_pad), jnp.float32),
            jax.ShapeDtypeStruct((B, n_pad, n_pad), arb_dtype),
            jax.ShapeDtypeStruct((B, 1, n_pad), jnp.float32),
        ),
        compiler_params=pltpu.CompilerParams(
            dimension_semantics=("parallel",),   # batch blocks are independent
            vmem_limit_bytes=vmem_limit,
        ),
    )(lengths, logits_p, u)

    # Crop the lane padding back off.
    return arb[:, :N, :N], stats[:, :, :N], z[:, :N, :N]


if __name__ == "__main__":
    key = jax.random.PRNGKey(0)
    k_logits, k_u = jax.random.split(key)
    B, N = 2, 16
    logits = jax.random.normal(k_logits, (B, N, N), dtype=jnp.float32)
    lengths = jnp.array([16, 11], dtype=jnp.int32)

    arb, stats, z = edmonds_sampler(logits, lengths, k_u)
    jax.block_until_ready((arb, stats, z))
    print("KERNEL_OK")
</pallas_src>

<mosaic_0001>
module attributes {stable_mosaic.version = 11 : i64} {
  func.func @_edmonds_sampler_kernel(%arg0: i32, %arg1: memref<2xi32, #tpu.memory_space<smem>>, %arg2: memref<2x128x128xf32, #tpu.memory_space<vmem>>, %arg3: memref<2x128x128xf32, #tpu.memory_space<vmem>>, %arg4: memref<2x128x128xf32, #tpu.memory_space<vmem>>, %arg5: memref<2x128x128xf32, #tpu.memory_space<vmem>>, %arg6: memref<2x1x128xf32, #tpu.memory_space<vmem>>) attributes {dimension_semantics = [#tpu.dimension_semantics<parallel>], iteration_bounds = array<i64: 1>, scalar_prefetch = 1 : i64, scratch_operands = 0 : i64, tpu.core_type = #tpu.core_type<tc>, window_params = [{transform_indices = @transform_0, window_bounds = array<i64: 2, 128, 128>}, {transform_indices = @transform_1, window_bounds = array<i64: 2, 128, 128>}, {transform_indices = @transform_2, window_bounds = array<i64: 2, 128, 128>}, {transform_indices = @transform_3, window_bounds = array<i64: 2, 128, 128>}, {transform_indices = @transform_4, window_bounds = array<i64: 2, 1, 128>}]} {
    %c0 = arith.constant 0 : index
    %c0_0 = arith.constant 0 : index
    %c0_1 = arith.constant 0 : index
    %0 = vector.load %arg3[%c0, %c0_0, %c0_1] : memref<2x128x128xf32, #tpu.memory_space<vmem>>, vector<2x128x128xf32>
    %cst = arith.constant 1.000000e+00 : f32
    %cst_2 = arith.constant 1.1920929E-7 : f32
    %1 = arith.subf %cst, %cst_2 : f32
    %cst_3 = arith.constant 1.1920929E-7 : f32
    %2 = vector.broadcast %cst_3 : f32 to vector<2x128x128xf32>
    %3 = arith.maximumf %2, %0 : vector<2x128x128xf32>
    %4 = vector.broadcast %1 : f32 to vector<2x128x128xf32>
    %5 = arith.minimumf %4, %3 : vector<2x128x128xf32>
    %c0_4 = arith.constant 0 : index
    %c0_5 = arith.constant 0 : index
    %c0_6 = arith.constant 0 : index
    %6 = vector.load %arg2[%c0_4, %c0_5, %c0_6] : memref<2x128x128xf32, #tpu.memory_space<vmem>>, vector<2x128x128xf32>
    %7 = math.log %5 : vector<2x128x128xf32>
    %cst_7 = arith.constant 0.000000e+00 : f32
    %8 = vector.broadcast %cst_7 : f32 to vector<2x128x128xf32>
    %9 = arith.subf %8, %7 : vector<2x128x128xf32>
    %10 = math.log %9 : vector<2x128x128xf32>
    %cst_8 = arith.constant 0.000000e+00 : f32
    %11 = vector.broadcast %cst_8 : f32 to vector<2x128x128xf32>
    %12 = arith.subf %11, %10 : vector<2x128x128xf32>
    %13 = arith.addf %6, %12 : vector<2x128x128xf32>
    %c0_9 = arith.constant 0 : index
    %c0_10 = arith.constant 0 : index
    %c0_11 = arith.constant 0 : index
    %14 = vector.load %arg4[%c0_9, %c0_10, %c0_11] : memref<2x128x128xf32, #tpu.memory_space<vmem>>, vector<2x128x128xf32>
    tpu.vector_store %arg4[%c0_9, %c0_10, %c0_11], %13 {strides = array<i32>} : memref<2x128x128xf32, #tpu.memory_space<vmem>>, vector<2x128x128xf32>,
    %c2_i32 = arith.constant 2 : i32
    %15 = arith.muli %arg0, %c2_i32 : i32
    %c0_i32 = arith.constant 0 : i32
    %16 = arith.addi %15, %c0_i32 : i32
    %17 = arith.index_cast %16 : i32 to index
    %18 = memref.load %arg1[%17] : memref<2xi32, #tpu.memory_space<smem>>
    %19 = vector.broadcast %18 : i32 to vector<1x1x128xi32>
    %c1_i32 = arith.constant 1 : i32
    %20 = arith.addi %15, %c1_i32 : i32
    %21 = arith.index_cast %20 : i32 to index
    %22 = memref.load %arg1[%21] : memref<2xi32, #tpu.memory_space<smem>>
    %23 = vector.broadcast %22 : i32 to vector<1x1x128xi32>
    %24 = tpu.concatenate %19, %23 in 0 : vector<1x1x128xi32>, vector<1x1x128xi32> -> vector<2x1x128xi32>
    %25 = tpu.iota {dimensions = array<i32: 1>} : vector<2x128x128xi32>
    %26 = tpu.iota {dimensions = array<i32: 2>} : vector<2x128x128xi32>
    %27 = vector.broadcast %24 : vector<2x1x128xi32> to vector<2x128x128xi32>
    %28 = arith.cmpi slt, %25, %27 : vector<2x128x128xi32>
    %29 = vector.broadcast %24 : vector<2x1x128xi32> to vector<2x128x128xi32>
    %30 = arith.cmpi slt, %26, %29 : vector<2x128x128xi32>
    %31 = arith.andi %28, %30 : vector<2x128x128xi1>
    %32 = arith.cmpi ne, %25, %26 : vector<2x128x128xi32>
    %33 = arith.andi %31, %32 : vector<2x128x128xi1>
    %c1_i32_12 = arith.constant 1 : i32
    %34 = vector.broadcast %c1_i32_12 : i32 to vector<2x128x128xi32>
    %35 = arith.cmpi sge, %26, %34 : vector<2x128x128xi32>
    %36 = arith.andi %33, %35 : vector<2x128x128xi1>
    %cst_13 = arith.constant -1.000000e+30 : f32
    %37 = vector.broadcast %cst_13 : f32 to vector<2x128x128xf32>
    %38 = arith.select %36, %13, %37 : vector<2x128x128xi1>, vector<2x128x128xf32>
    %cst_14 = arith.constant dense<0xFF800000> : vector<2x128xf32>
    %39 = vector.multi_reduction <maximumf>, %38, %cst_14 [1] : vector<2x128x128xf32> to vector<2x128xf32>
    %40 = vector.shape_cast %39 : vector<2x128xf32> to vector<2x1x128xf32>
    %41 = vector.broadcast %40 : vector<2x1x128xf32> to vector<2x128x128xf32>
    %42 = arith.cmpf oge, %38, %41 : vector<2x128x128xf32>
    %c128_i32 = arith.constant 128 : i32
    %43 = vector.broadcast %c128_i32 : i32 to vector<2x128x128xi32>
    %44 = arith.select %42, %25, %43 : vector<2x128x128xi1>, vector<2x128x128xi32>
    %cst_15 = arith.constant dense<2147483647> : vector<2x128xi32>
    %45 = vector.multi_reduction <minsi>, %44, %cst_15 [1] : vector<2x128x128xi32> to vector<2x128xi32>
    %46 = vector.shape_cast %45 : vector<2x128xi32> to vector<2x1x128xi32>
    %47 = vector.broadcast %46 : vector<2x1x128xi32> to vector<2x128x128xi32>
    %48 = arith.cmpi eq, %25, %47 : vector<2x128x128xi32>
    %49 = arith.andi %48, %36 : vector<2x128x128xi1>
    %cst_16 = arith.constant 1.000000e+00 : f32
    %cst_17 = arith.constant 0.000000e+00 : f32
    %50 = vector.broadcast %cst_16 : f32 to vector<2x128x128xf32>
    %51 = vector.broadcast %cst_17 : f32 to vector<2x128x128xf32>
    %52 = arith.select %49, %50, %51 : vector<2x128x128xi1>, vector<2x128x128xf32>
    %c0_18 = arith.constant 0 : index
    %c0_19 = arith.constant 0 : index
    %c0_20 = arith.constant 0 : index
    %53 = vector.load %arg5[%c0_18, %c0_19, %c0_20] : memref<2x128x128xf32, #tpu.memory_space<vmem>>, vector<2x128x128xf32>
    tpu.vector_store %arg5[%c0_18, %c0_19, %c0_20], %52 {strides = array<i32>} : memref<2x128x128xf32, #tpu.memory_space<vmem>>, vector<2x128x128xf32>,
    %cst_21 = arith.constant -1.000000e+30 : f32
    %cst_22 = arith.constant 5.000000e-01 : f32
    %54 = arith.mulf %cst_21, %cst_22 : f32
    %55 = vector.broadcast %54 : f32 to vector<2x1x128xf32>
    %56 = arith.cmpf ogt, %40, %55 : vector<2x1x128xf32>
    %cst_23 = arith.constant 0.000000e+00 : f32
    %57 = vector.broadcast %cst_23 : f32 to vector<2x1x128xf32>
    %58 = arith.select %56, %40, %57 : vector<2x1x128xi1>, vector<2x1x128xf32>
    %c0_24 = arith.constant 0 : index
    %c0_25 = arith.constant 0 : index
    %c0_26 = arith.constant 0 : index
    %59 = vector.load %arg6[%c0_24, %c0_25, %c0_26] : memref<2x1x128xf32, #tpu.memory_space<vmem>>, vector<2x1x128xf32>
    tpu.vector_store %arg6[%c0_24, %c0_25, %c0_26], %58 {strides = array<i32>} : memref<2x1x128xf32, #tpu.memory_space<vmem>>, vector<2x1x128xf32>,
    return
  }
  func.func @transform_0(%arg0: i32, %arg1: memref<2xi32, #tpu.memory_space<smem>>) -> (i32, i32, i32) {
    %c0_i32 = arith.constant 0 : i32
    %c0_i32_0 = arith.constant 0 : i32
    %c0_i32_1 = arith.constant 0 : i32
    return %arg0, %c0_i32, %c0_i32_0 : i32, i32, i32
  }
  func.func @transform_1(%arg0: i32, %arg1: memref<2xi32, #tpu.memory_space<smem>>) -> (i32, i32, i32) {
    %c0_i32 = arith.constant 0 : i32
    %c0_i32_0 = arith.constant 0 : i32
    %c0_i32_1 = arith.constant 0 : i32
    return %arg0, %c0_i32, %c0_i32_0 : i32, i32, i32
  }
  func.func @transform_2(%arg0: i32, %arg1: memref<2xi32, #tpu.memory_space<smem>>) -> (i32, i32, i32) {
    %c0_i32 = arith.constant 0 : i32
    %c0_i32_0 = arith.constant 0 : i32
    %c0_i32_1 = arith.constant 0 : i32
    return %arg0, %c0_i32, %c0_i32_0 : i32, i32, i32
  }
  func.func @transform_3(%arg0: i32, %arg1: memref<2xi32, #tpu.memory_space<smem>>) -> (i32, i32, i32) {
    %c0_i32 = arith.constant 0 : i32
    %c0_i32_0 = arith.constant 0 : i32
    %c0_i32_1 = arith.constant 0 : i32
    return %arg0, %c0_i32, %c0_i32_0 : i32, i32, i32
  }
  func.func @transform_4(%arg0: i32, %arg1: memref<2xi32, #tpu.memory_space<smem>>) -> (i32, i32, i32) {
    %c0_i32 = arith.constant 0 : i32
    %c0_i32_0 = arith.constant 0 : i32
    %c0_i32_1 = arith.constant 0 : i32
    return %arg0, %c0_i32, %c0_i32_0 : i32, i32, i32
  }
}

</mosaic_0001>

<bundles_post_ra>
// kernel: edmonds_sampler.1
= control target key start
LH: loop header
LB: loop body
LE: loop exit
PB: predicated region body
PF: predicated region fallthrough
CT: control target
= control target key end

     0   :  { %s1132_s21 = smov [#allocation3]   ;;  %s3227_s0 = inlined_call_operand.vmem [shape: s32[2], index: 0, kind: input, shape index: {}]   ;;  %s3228_s1 = inlined_call_operand.vmem [shape: f32[2,128,128], index: 1, kind: input, shape index: {}]   ;;  %s3229_s2 = inlined_call_operand.vmem [shape: f32[2,128,128], index: 2, kind: input, shape index: {}]   ;;  %s3230_s3 = inlined_call_operand.vmem [shape: f32[2,128,128], index: 3, kind: output, shape index: {0}]   ;;  %s3231_s4 = inlined_call_operand.vmem [shape: f32[2,128,128], index: 4, kind: output, shape index: {1}]   ;;  %s3232_s5 = inlined_call_operand.hbm [shape: f32[2,1,128], index: 5, kind: output, shape index: {2}]  }
   0x1   :  { %s12_s20 = sshll.u32 %s3227_s0, 4  ;;  %s13_s20 = int_to_ptr.vmem [resolvable:$true] %s12_s20 }
   0x2   :  { %15 = dma.vmem_to_smem %s13_s20, 16, %s1132_s21, [#allocation2] }
   0x3   :  { %1128 = dma.done.wait [#allocation2], 16 }
   0x4   :  { %1129 = vsyncadd [#allocation2], 4294967280 }
   0x5   :  { %18 = sfence }
   0x6   :  { %v24_v0 = vld [vmem:[%s3229_s2] sm:$0xff]  ;;  %v25_v1 = vld [vmem:[%s3229_s2 + $0x8] sm:$0xff]  ;;  %v26_v2 = vld [vmem:[%s3229_s2 + $0x10] sm:$0xff] }
   0x7   :  { %v27_v3 = vld [vmem:[%s3229_s2 + $0x18] sm:$0xff]  ;;  %v28_v4 = vld [vmem:[%s3229_s2 + $0x20] sm:$0xff]  ;;  %v29_v5 = vld [vmem:[%s3229_s2 + $0x28] sm:$0xff]  ;;  %v56_v6 = vmax.f32 %v24_v0, 1.1920929e-07  ;;  %v57_v8 = vmax.f32 %v25_v1, 1.1920929e-07  ;;  %v58_v9 = vmax.f32 %v26_v2, 1.1920929e-07 }
   0x8   :  { %v30_v7 = vld [vmem:[%s3229_s2 + $0x30] sm:$0xff]  ;;  %v31_v10 = vld [vmem:[%s3229_s2 + $0x38] sm:$0xff]  ;;  %v59_v11 = vmax.f32 %v27_v3, 1.1920929e-07  ;;  %v60_v12 = vmax.f32 %v28_v4, 1.1920929e-07  ;;  %v32_v13 = vld [vmem:[%s3229_s2 + $0x40] sm:$0xff]  ;;  %v61_v14 = vmax.f32 %v29_v5, 1.1920929e-07 }
   0x9   :  { %v33_v15 = vld [vmem:[%s3229_s2 + $0x48] sm:$0xff]  ;;  %v62_v16 = vmax.f32 %v30_v7, 1.1920929e-07  ;;  %v88_v17 = vmin.f32 %v56_v6, 0.9999999  ;;  %v34_v18 = vld [vmem:[%s3229_s2 + $0x50] sm:$0xff]  ;;  %v63_v19 = vmax.f32 %v31_v10, 1.1920929e-07 }
   0xa   :  { %v89_v20 = vmin.f32 %v57_v8, 0.9999999  ;;  %v90_v21 = vmin.f32 %v58_v9, 0.9999999  ;;  %v35_v22 = vld [vmem:[%s3229_s2 + $0x58] sm:$0xff]  ;;  %v64_v23 = vmax.f32 %v32_v13, 1.1920929e-07 }
   0xb   :  { %v91_v24 = vmin.f32 %v59_v11, 0.9999999  ;;  %v92_v25 = vmin.f32 %v60_v12, 0.9999999  ;;  %964 = vlog2.f32 %v88_v17  ;;  %v36_v26 = vld [vmem:[%s3229_s2 + $0x60] sm:$0xff]  ;;  %v65_v27 = vmax.f32 %v33_v15, 1.1920929e-07 }
   0xc   :  { %v93_v28 = vmin.f32 %v61_v14, 0.9999999  ;;  %966 = vlog2.f32 %v89_v20  ;;  %v37_v29 = vld [vmem:[%s3229_s2 + $0x68] sm:$0xff]  ;;  %v66_v30 = vmax.f32 %v34_v18, 1.1920929e-07  ;;  %v94_v31 = vmin.f32 %v62_v16, 0.9999999 }
   0xd   :  { %968 = vlog2.f32 %v90_v21  ;;  %v38_v32 = vld [vmem:[%s3229_s2 + $0x70] sm:$0xff]  ;;  %v67_v33 = vmax.f32 %v35_v22, 1.1920929e-07  ;;  %v95_v34 = vmin.f32 %v63_v19, 0.9999999  ;;  %v39_v35 = vld [vmem:[%s3229_s2 + $0x78] sm:$0xff]  ;;  %v68_v36 = vmax.f32 %v36_v26, 1.1920929e-07 }
   0xe   :  { %970 = vlog2.f32 %v91_v24  ;;  %v96_v37 = vmin.f32 %v64_v23, 0.9999999  ;;  %v69_v38 = vmax.f32 %v37_v29, 1.1920929e-07  ;;  %v97_v39 = vmin.f32 %v65_v27, 0.9999999 }
   0xf   :  { %972 = vlog2.f32 %v92_v25  ;;  %v70_v41 = vmax.f32 %v38_v32, 1.1920929e-07  ;;  %v98_v42 = vmin.f32 %v66_v30, 0.9999999  ;;  %v71_v44 = vmax.f32 %v39_v35, 1.1920929e-07 }
  0x10   :  { %974 = vlog2.f32 %v93_v28  ;;  %v99_v45 = vmin.f32 %v67_v33, 0.9999999  ;;  %v100_v47 = vmin.f32 %v68_v36, 0.9999999  ;;  %v101_v50 = vmin.f32 %v69_v38, 0.9999999 }
  0x11   :  { %v965_v40 = vpop.eup %964  ;;  %976 = vlog2.f32 %v94_v31  ;;  %v102_v53 = vmin.f32 %v70_v41, 0.9999999 }
  0x12   :  { %v967_v43 = vpop.eup %966  ;;  %978 = vlog2.f32 %v95_v34  ;;  %v153_v48 = vmul.f32 0.6931472, %v965_v40 }
  0x13   :  { %v969_v46 = vpop.eup %968  ;;  %980 = vlog2.f32 %v96_v37  ;;  %v155_v51 = vmul.f32 0.6931472, %v967_v43 }
  0x14   :  { %v971_v49 = vpop.eup %970  ;;  %982 = vlog2.f32 %v97_v39  ;;  %v157_v54 = vmul.f32 0.6931472, %v969_v46 }
  0x15   :  { %v973_v52 = vpop.eup %972  ;;  %984 = vlog2.f32 %v98_v42 }
  0x16   :  { %19 = vsyncpa [#allocation5], 0  ;;  %v975_v55 = vpop.eup %974  ;;  %v103_v56 = vmin.f32 %v71_v44, 0.9999999  ;;  %v159_v57 = vmul.f32 0.6931472, %v971_v49  ;;  %986 = vlog2.f32 %v99_v45 }
  0x17   :  { %v977_v58 = vpop.eup %976  ;;  %v161_v59 = vmul.f32 0.6931472, %v973_v52  ;;  %988 = vlog2.f32 %v100_v47  ;;  %v216_v60 = vsub.f32 0.0, %v153_v48  ;;  %v163_v62 = vmul.f32 0.6931472, %v975_v55  ;;  %v120_v32 = vld [vmem:[%s3228_s1] sm:$0xff] }
  0x18   :  { %v979_v61 = vpop.eup %978  ;;  %990 = vlog2.f32 %v101_v50  ;;  %v217_v63 = vsub.f32 0.0, %v155_v51  ;;  %v165_v1 = vmul.f32 0.6931472, %v977_v58  ;;  %v218_v2 = vsub.f32 0.0, %v157_v54  ;;  %v121_v37 = vld [vmem:[%s3228_s1 + $0x8] sm:$0xff]  ;;  %v122_v42 = vld [vmem:[%s3228_s1 + $0x10] sm:$0xff] }
  0x19   :  { %v981_v0 = vpop.eup %980  ;;  %992 = vlog2.f32 %v102_v53  ;;  %v167_v4 = vmul.f32 0.6931472, %v979_v61  ;;  %v219_v5 = vsub.f32 0.0, %v159_v57  ;;  %v220_v8 = vsub.f32 0.0, %v161_v59  ;;  %v123_v47 = vld [vmem:[%s3228_s1 + $0x18] sm:$0xff]  ;;  %v124_v52 = vld [vmem:[%s3228_s1 + $0x20] sm:$0xff] }
  0x1a   :  { %v983_v3 = vpop.eup %982  ;;  %994 = vlog2.f32 %v103_v56  ;;  %v169_v7 = vmul.f32 0.6931472, %v981_v0  ;;  %v221_v11 = vsub.f32 0.0, %v163_v62  ;;  %v222_v14 = vsub.f32 0.0, %v165_v1  ;;  %s1237_s12 = sld [smem:[#allocation3]]  ;;  %v125_v57 = vld [vmem:[%s3228_s1 + $0x28] sm:$0xff] }
  0x1b   :  { %v985_v6 = vpop.eup %984  ;;  %996 = vlog2.f32 %v216_v60  ;;  %v171_v10 = vmul.f32 0.6931472, %v983_v3  ;;  %v223_v17 = vsub.f32 0.0, %v167_v4  ;;  %v126_v62 = vld [vmem:[%s3228_s1 + $0x30] sm:$0xff]  ;;  %v127_v3 = vld [vmem:[%s3228_s1 + $0x38] sm:$0xff]  ;;  %s2089_s24 = sld [smem:[#allocation3 + $0x1]] }
  0x1c   :  { %v987_v9 = vpop.eup %986  ;;  %998 = vlog2.f32 %v217_v63  ;;  %v173_v13 = vmul.f32 0.6931472, %v985_v6  ;;  %v224_v21 = vsub.f32 0.0, %v169_v7  ;;  %s942_s7 = sshll.u32 %s3232_s5, 4  ;;  %s1134_s5 = smov 16   ;;  %s943_s7 = int_to_ptr.hbm [resolvable:$true] %s942_s7 }
  0x1d   :  { %v989_v12 = vpop.eup %988  ;;  %1000 = vlog2.f32 %v218_v2  ;;  %v175_v16 = vmul.f32 0.6931472, %v987_v9  ;;  %v225_v24 = vsub.f32 0.0, %v171_v10  ;;  %s1135_s8 = smov 1  }
  0x1e   :  { %v991_v15 = vpop.eup %990  ;;  %1002 = vlog2.f32 %v219_v5  ;;  %v177_v19 = vmul.f32 0.6931472, %v989_v12  ;;  %v226_v27 = vsub.f32 0.0, %v173_v13  ;;  %v129_v13 = vld [vmem:[%s3228_s1 + $0x48] sm:$0xff] }
  0x1f   :  { %v993_v18 = vpop.eup %992  ;;  %v179_v20 = vmul.f32 0.6931472, %v991_v15  ;;  %1004 = vlog2.f32 %v220_v8  ;;  %v227_v29 = vsub.f32 0.0, %v175_v16  ;;  %v128_v8 = vld [vmem:[%s3228_s1 + $0x40] sm:$0xff] }
  0x20   :  { %v995_v22 = vpop.eup %994  ;;  %v181_v23 = vmul.f32 0.6931472, %v993_v18  ;;  %1006 = vlog2.f32 %v221_v11  ;;  %v228_v33 = vsub.f32 0.0, %v177_v19  ;;  %v130_v19 = vld [vmem:[%s3228_s1 + $0x50] sm:$0xff] }
  0x21   :  { %v997_v25 = vpop.eup %996  ;;  %v183_v26 = vmul.f32 0.6931472, %v995_v22  ;;  %1008 = vlog2.f32 %v222_v14  ;;  %v229_v34 = vsub.f32 0.0, %v179_v20 }
  0x22   :  { %v999_v28 = vpop.eup %998  ;;  %v249_v30 = vmul.f32 0.6931472, %v997_v25  ;;  %1010 = vlog2.f32 %v223_v17  ;;  %v230_v38 = vsub.f32 0.0, %v181_v23  ;;  %v414_v17 = vlaneseq }
  0x23   :  { %v1001_v31 = vpop.eup %1000  ;;  %v251_v35 = vmul.f32 0.6931472, %v999_v28  ;;  %1012 = vlog2.f32 %v224_v21  ;;  %v231_v43 = vsub.f32 0.0, %v183_v26 }
  0x24   :  { %v1003_v36 = vpop.eup %1002  ;;  %v253_v39 = vmul.f32 0.6931472, %v1001_v31  ;;  %1014 = vlog2.f32 %v225_v24  ;;  %v312_v40 = vsub.f32 0.0, %v249_v30  ;;  %v131_v24 = vld [vmem:[%s3228_s1 + $0x58] sm:$0xff] }
  0x25   :  { %v1005_v41 = vpop.eup %1004  ;;  %v255_v44 = vmul.f32 0.6931472, %v1003_v36  ;;  %1016 = vlog2.f32 %v226_v27  ;;  %v313_v45 = vsub.f32 0.0, %v251_v35  ;;  %v133_v35 = vld [vmem:[%s3228_s1 + $0x68] sm:$0xff] }
  0x26   :  { %v1007_v46 = vpop.eup %1006  ;;  %v257_v48 = vmul.f32 0.6931472, %v1005_v41  ;;  %1018 = vlog2.f32 %v227_v29  ;;  %v314_v49 = vsub.f32 0.0, %v253_v39  ;;  %v1230_v50 = vadd.f32 %v312_v40, %v120_v32  ;;  %v132_v29 = vld [vmem:[%s3228_s1 + $0x60] sm:$0xff]  ;;  %v134_v40 = vld [vmem:[%s3228_s1 + $0x70] sm:$0xff] }
  0x27   :  { %v1009_v51 = vpop.eup %1008  ;;  %v259_v53 = vmul.f32 0.6931472, %v1007_v46  ;;  %1020 = vlog2.f32 %v228_v33  ;;  %v315_v54 = vsub.f32 0.0, %v255_v44  ;;  %v1235_v55 = vadd.f32 %v313_v45, %v121_v37  ;;  %v135_v44 = vld [vmem:[%s3228_s1 + $0x78] sm:$0xff] }
  0x28   :  { %v1011_v56 = vpop.eup %1010  ;;  %v261_v58 = vmul.f32 0.6931472, %v1009_v51  ;;  %1022 = vlog2.f32 %v229_v34  ;;  %v316_v59 = vsub.f32 0.0, %v257_v48  ;;  %v1242_v60 = vadd.f32 %v314_v49, %v122_v42  ;;  %376 = vst [vmem:[%s3230_s3] sm:$0xff] %v1230_v50 }
  0x29   :  { %v1013_v61 = vpop.eup %1012  ;;  %v263_v63 = vmul.f32 0.6931472, %v1011_v56  ;;  %1024 = vlog2.f32 %v230_v38  ;;  %v317_v0 = vsub.f32 0.0, %v259_v53  ;;  %v1251_v1 = vadd.f32 %v315_v54, %v123_v47  ;;  %377 = vst [vmem:[%s3230_s3 + $0x8] sm:$0xff] %v1235_v55  ;;  %v40_v53 = vld [vmem:[%s3229_s2 + $0x80] sm:$0xff] }
  0x2a   :  { %v1015_v2 = vpop.eup %1014  ;;  %v265_v4 = vmul.f32 0.6931472, %v1013_v61  ;;  %1026 = vlog2.f32 %v231_v43  ;;  %v318_v5 = vsub.f32 0.0, %v261_v58  ;;  %v1260_v6 = vadd.f32 %v316_v59, %v124_v52  ;;  %378 = vst [vmem:[%s3230_s3 + $0x10] sm:$0xff] %v1242_v60  ;;  %v42_v61 = vld [vmem:[%s3229_s2 + $0x90] sm:$0xff] }
  0x2b   :  { %v1017_v7 = vpop.eup %1016  ;;  %v267_v9 = vmul.f32 0.6931472, %v1015_v2  ;;  %v319_v10 = vsub.f32 0.0, %v263_v63  ;;  %v1269_v11 = vadd.f32 %v317_v0, %v125_v57  ;;  %379 = vst [vmem:[%s3230_s3 + $0x18] sm:$0xff] %v1251_v1  ;;  %v410_v33 = vstv %s1237_s12  ;;  %v41_v57 = vld [vmem:[%s3229_s2 + $0x88] sm:$0xff]  ;;  %v43_v0 = vld [vmem:[%s3229_s2 + $0x98] sm:$0xff] }
  0x2c   :  { %v1019_v12 = vpop.eup %1018  ;;  %v269_v14 = vmul.f32 0.6931472, %v1017_v7  ;;  %v320_v15 = vsub.f32 0.0, %v265_v4  ;;  %v1278_v16 = vadd.f32 %v318_v5, %v126_v62  ;;  %380 = vst [vmem:[%s3230_s3 + $0x20] sm:$0xff] %v1260_v6  ;;  %v1317_v39 = vshrl.u32 %v414_v17, 7  ;;  %v44_v5 = vld [vmem:[%s3229_s2 + $0xa0] sm:$0xff] }
  0x2d   :  { %v1021_v18 = vpop.eup %1020  ;;  %v271_v20 = vmul.f32 0.6931472, %v1019_v12  ;;  %v321_v21 = vsub.f32 0.0, %v267_v9  ;;  %v1287_v22 = vadd.f32 %v319_v10, %v127_v3  ;;  %381 = vst [vmem:[%s3230_s3 + $0x28] sm:$0xff] %v1269_v11  ;;  %v1343_v49 = vperm.slane %v410_v33, 0  ;;  %v45_v12 = vld [vmem:[%s3229_s2 + $0xa8] sm:$0xff] }
  0x2e   :  { %v1023_v23 = vpop.eup %1022  ;;  %v273_v25 = vmul.f32 0.6931472, %v1021_v18  ;;  %v322_v26 = vsub.f32 0.0, %v269_v14  ;;  %v1296_v27 = vadd.f32 %v320_v15, %v128_v8  ;;  %382 = vst [vmem:[%s3230_s3 + $0x30] sm:$0xff] %v1278_v16  ;;  %v1352_v52 = vadd.s32 8, %v1317_v39  ;;  %v46_v18 = vld [vmem:[%s3229_s2 + $0xb0] sm:$0xff] }
  0x2f   :  { %v1025_v28 = vpop.eup %1024  ;;  %v275_v30 = vmul.f32 0.6931472, %v1023_v23  ;;  %v323_v31 = vsub.f32 0.0, %v271_v20  ;;  %v1305_v32 = vadd.f32 %v321_v21, %v129_v13  ;;  %383 = vst [vmem:[%s3230_s3 + $0x38] sm:$0xff] %v1287_v22  ;;  %v1363_v56 = vand.u32 127, %v414_v17  ;;  %v47_v21 = vld [vmem:[%s3229_s2 + $0xb8] sm:$0xff] }
  0x30   :  { %v1027_v34 = vpop.eup %1026  ;;  %v277_v36 = vmul.f32 0.6931472, %v1025_v28  ;;  %v324_v37 = vsub.f32 0.0, %v273_v25  ;;  %v1315_v38 = vadd.f32 %v322_v26, %v130_v19  ;;  %384 = vst [vmem:[%s3230_s3 + $0x40] sm:$0xff] %v1296_v27  ;;  %v1373_v58 = vadd.s32 16, %v1317_v39  ;;  %v48_v28 = vld [vmem:[%s3229_s2 + $0xc0] sm:$0xff] }
  0x31   :  { %v279_v41 = vmul.f32 0.6931472, %v1027_v34  ;;  %v325_v42 = vsub.f32 0.0, %v275_v30  ;;  %v1326_v43 = vadd.f32 %v323_v31, %v131_v24  ;;  %385 = vst [vmem:[%s3230_s3 + $0x48] sm:$0xff] %v1305_v32  ;;  %v1376_v59 = vadd.s32 24, %v1317_v39  ;;  %v49_v34 = vld [vmem:[%s3229_s2 + $0xc8] sm:$0xff] }
  0x32   :  { %v326_v45 = vsub.f32 0.0, %v277_v36  ;;  %v1335_v46 = vadd.f32 %v324_v37, %v132_v29  ;;  %386 = vst [vmem:[%s3230_s3 + $0x50] sm:$0xff] %v1315_v38  ;;  %v1386_v62 = vadd.s32 32, %v1317_v39  ;;  %v1389_v63 = vadd.s32 40, %v1317_v39 }
  0x33   :  { %v327_v47 = vsub.f32 0.0, %v279_v41  ;;  %v1341_v48 = vadd.f32 %v325_v42, %v133_v35  ;;  %387 = vst [vmem:[%s3230_s3 + $0x58] sm:$0xff] %v1326_v43  ;;  %vm435_vm0 = vcmp.lt.s32.totalorder %v1317_v39, %v1343_v49  ;;  %v72_v2 = vmax.f32 %v40_v53, 1.1920929e-07 }
  0x34   :  { %v1349_v51 = vadd.f32 %v326_v45, %v134_v40  ;;  %388 = vst [vmem:[%s3230_s3 + $0x60] sm:$0xff] %v1335_v46  ;;  %v1401_v3 = vadd.s32 48, %v1317_v39  ;;  %v1404_v4 = vadd.s32 56, %v1317_v39  ;;  %vm436_vm1 = vcmp.lt.s32.totalorder %v1352_v52, %v1343_v49  ;;  %v50_v40 = vld [vmem:[%s3229_s2 + $0xd0] sm:$0xff] }
  0x35   :  { %v1361_v54 = vadd.f32 %v327_v47, %v135_v44  ;;  %389 = vst [vmem:[%s3230_s3 + $0x68] sm:$0xff] %v1341_v48  ;;  %v73_v7 = vmax.f32 %v41_v57, 1.1920929e-07  ;;  %v1412_v8 = vadd.s32 64, %v1317_v39  ;;  %v1415_v9 = vadd.s32 72, %v1317_v39  ;;  %v51_v57 = vld [vmem:[%s3229_s2 + $0xd8] sm:$0xff] }
  0x36   :  { %3303 = vst [vmem:[#allocation8_spill] sm:$0xff] %v1373_v58  ;;  %vm1419_vm2 = vcmp.lt.s32.totalorder %v1363_v56, %v1343_v49  ;;  %v74_v13 = vmax.f32 %v42_v61, 1.1920929e-07  ;;  %v1427_v14 = vadd.s32 80, %v1317_v39  ;;  %v1430_v15 = vadd.s32 88, %v1317_v39 }
  0x37   :  { %3304 = vst [vmem:[#allocation9_spill] sm:$0xff] %v1376_v59  ;;  %v1433_v17 = vadd.s32 96, %v1317_v39  ;;  %v75_v19 = vmax.f32 %v43_v0, 1.1920929e-07  ;;  %v1439_v20 = vadd.s32 104, %v1317_v39  ;;  %vm437_vm3 = vcmp.lt.s32.totalorder %v1373_v58, %v1343_v49  ;;  %vm1456_vm5 = vmand %vm435_vm0, %vm1419_vm2 }
  0x38   :  { %390 = vst [vmem:[%s3230_s3 + $0x70] sm:$0xff] %v1349_v51  ;;  %v76_v23 = vmax.f32 %v44_v5, 1.1920929e-07  ;;  %v104_v24 = vmin.f32 %v72_v2, 0.9999999  ;;  %v1447_v25 = vadd.s32 112, %v1317_v39  ;;  %vm438_vm4 = vcmp.lt.s32.totalorder %v1376_v59, %v1343_v49  ;;  %vm1473_vm7 = vmand %vm436_vm1, %vm1419_vm2  ;;  %v52_v5 = vld [vmem:[%s3229_s2 + $0xe0] sm:$0xff] }
  0x39   :  { %3305 = vst [vmem:[#allocation10_spill] sm:$0xff] %v1386_v62  ;;  %v77_v29 = vmax.f32 %v45_v12, 1.1920929e-07  ;;  %v105_v30 = vmin.f32 %v73_v7, 0.9999999  ;;  %v1464_v31 = vadd.s32 120, %v1317_v39  ;;  %vm439_vm6 = vcmp.lt.s32.totalorder %v1386_v62, %v1343_v49  ;;  %vm1489_vm10 = vmand %vm437_vm3, %vm1419_vm2 }
  0x3a   :  { %3306 = vst [vmem:[#allocation11_spill] sm:$0xff] %v1389_v63  ;;  %v78_v35 = vmax.f32 %v46_v18, 1.1920929e-07  ;;  %v106_v36 = vmin.f32 %v74_v13, 0.9999999  ;;  %vm440_vm8 = vcmp.lt.s32.totalorder %v1389_v63, %v1343_v49  ;;  %vm441_vm9 = vcmp.lt.s32.totalorder %v1401_v3, %v1343_v49  ;;  %vm1503_vm12 = vmand %vm438_vm4, %vm1419_vm2 }
  0x3b   :  { %391 = vst [vmem:[%s3230_s3 + $0x78] sm:$0xff] %v1361_v54  ;;  %v79_v41 = vmax.f32 %v47_v21, 1.1920929e-07  ;;  %v107_v42 = vmin.f32 %v75_v19, 0.9999999  ;;  %vm442_vm11 = vcmp.lt.s32.totalorder %v1404_v4, %v1343_v49  ;;  %v80_v45 = vmax.f32 %v48_v28, 1.1920929e-07  ;;  %vm1514_vm14 = vmand %vm439_vm6, %vm1419_vm2  ;;  %v53_v21 = vld [vmem:[%s3229_s2 + $0xe8] sm:$0xff] }
  0x3c   :  { %3307 = vst [vmem:[#allocation12_spill] sm:$0xff] %v1401_v3  ;;  %v108_v47 = vmin.f32 %v76_v23, 0.9999999  ;;  %1028 = vlog2.f32 %v104_v24  ;;  %vm443_vm13 = vcmp.lt.s32.totalorder %v1412_v8, %v1343_v49  ;;  %v81_v61 = vmax.f32 %v49_v34, 1.1920929e-07  ;;  %vm1528_vm0 = vmand %vm440_vm8, %vm1419_vm2 }
  0x3d   :  { %3308 = vst [vmem:[#allocation13_spill] sm:$0xff] %v1404_v4  ;;  %v109_v0 = vmin.f32 %v77_v29, 0.9999999  ;;  %1030 = vlog2.f32 %v105_v30  ;;  %vm444_vm15 = vcmp.lt.s32.totalorder %v1415_v9, %v1343_v49  ;;  %v82_v7 = vmax.f32 %v50_v40, 1.1920929e-07  ;;  %vm1544_vm4 = vmand %vm441_vm9, %vm1419_vm2  ;;  %v54_v29 = vld [vmem:[%s3229_s2 + $0xf0] sm:$0xff] }
  0x3e   :  { %v110_v12 = vmin.f32 %v78_v35, 0.9999999  ;;  %1032 = vlog2.f32 %v106_v36  ;;  %vm445_vm1 = vcmp.lt.s32.totalorder %v1427_v14, %v1343_v49  ;;  %v111_v18 = vmin.f32 %v79_v41, 0.9999999  ;;  %vm1555_vm8 = vmand %vm442_vm11, %vm1419_vm2 }
  0x3f   :  { %1034 = vlog2.f32 %v107_v42  ;;  %v83_v23 = vmax.f32 %v51_v57, 1.1920929e-07  ;;  %v112_v24 = vmin.f32 %v80_v45, 0.9999999  ;;  %vm1567_vm9 = vmand %vm443_vm13, %vm1419_vm2  ;;  %v84_v30 = vmax.f32 %v52_v5, 1.1920929e-07  ;;  %v55_v45 = vld [vmem:[%s3229_s2 + $0xf8] sm:$0xff] }
  0x40   :  { %1036 = vlog2.f32 %v108_v47  ;;  %v113_v34 = vmin.f32 %v81_v61, 0.9999999  ;;  %vm1583_vm13 = vmand %vm444_vm15, %vm1419_vm2  ;;  %v114_v40 = vmin.f32 %v82_v7, 0.9999999  ;;  %v3331_v42 = vmov 0 }
  0x41   :  { %1038 = vlog2.f32 %v109_v0  ;;  %vm1596_vm6 = vmand %vm445_vm1, %vm1419_vm2  ;;  %v85_v47 = vmax.f32 %v53_v21, 1.1920929e-07  ;;  %vm3333_vm3 = vcmp.lt.s32.totalorder %v1430_v15, %v1343_v49  ;;  %v3334_v61 = vmov 0 }
  0x42   :  { %v1029_v35 = vpop.eup %1028  ;;  %1040 = vlog2.f32 %v110_v12  ;;  %v3332_v42 = vsel %vm1596_vm6, 4294967295, %v3331_v42  ;;  %vm1610_vm11 = vmand %vm3333_vm3, %vm1419_vm2  ;;  %vm3336_vm15 = vcmp.ne.s32.totalorder %v1317_v39, %v1363_v56  ;;  %v3337_v0 = vmov 0 }
  0x43   :  { %v1031_v41 = vpop.eup %1030  ;;  %1042 = vlog2.f32 %v111_v18  ;;  %v3335_v61 = vsel %vm1610_vm11, 4294967295, %v3334_v61  ;;  %vm1621_vm6 = vmand %vm1456_vm5, %vm3336_vm15  ;;  %v86_v5 = vmax.f32 %v54_v29, 1.1920929e-07  ;;  %v115_v7 = vmin.f32 %v83_v23, 0.9999999 }
  0x44   :  { %v1033_v57 = vpop.eup %1032  ;;  %v3338_v0 = vsel %vm1621_vm6, 4294967295, %v3337_v0  ;;  %1044 = vlog2.f32 %v112_v24  ;;  %vm3339_vm1 = vcmp.lt.s32.totalorder %v1433_v17, %v1343_v49  ;;  %vm3342_vm15 = vcmp.ne.s32.totalorder %v1352_v52, %v1363_v56 }
  0x45   :  { %v1035_v12 = vpop.eup %1034  ;;  %vm1632_vm11 = vmand %vm3339_vm1, %vm1419_vm2  ;;  %v116_v21 = vmin.f32 %v84_v30, 0.9999999  ;;  %1046 = vlog2.f32 %v113_v34  ;;  %vm3345_vm1 = vcmp.lt.s32.totalorder %v1439_v20, %v1343_v49  ;;  %v3346_v24 = vmov 0 }
  0x46   :  { %vm1643_vm6 = vmand %vm1473_vm7, %vm3342_vm15  ;;  %v1037_v23 = vpop.eup %1036  ;;  %vm3348_vm7 = vcmp.ne.s32.totalorder %v1373_v58, %v1363_v56  ;;  %v3349_v33 = vmov 0  ;;  %v87_v29 = vmax.f32 %v55_v45, 1.1920929e-07  ;;  %1048 = vlog2.f32 %v114_v40 }
  0x47   :  { %vm1652_vm3 = vmand %vm3345_vm1, %vm1419_vm2  ;;  %v1039_v30 = vpop.eup %1038  ;;  %vm3351_vm1 = vcmp.lt.s32.totalorder %v1447_v25, %v1343_v49  ;;  %v3355_v37 = vmov 0  ;;  %v117_v40 = vmin.f32 %v85_v47, 0.9999999  ;;  %1050 = vlog2.f32 %v115_v7 }
  0x48   :  { %v3347_v24 = vsel %vm1652_vm3, 4294967295, %v3346_v24  ;;  %vm1663_vm15 = vmand %vm1489_vm10, %vm3348_vm7  ;;  %vm3354_vm7 = vcmp.ne.s32.totalorder %v1376_v59, %v1363_v56  ;;  %v1041_v45 = vpop.eup %1040  ;;  %v185_v47 = vmul.f32 0.6931472, %v1029_v35  ;;  %1052 = vlog2.f32 %v116_v21 }
  0x49   :  { %v3350_v33 = vsel %vm1663_vm15, 4294967295, %v3349_v33  ;;  %vm1672_vm3 = vmand %vm3351_vm1, %vm1419_vm2  ;;  %vm3357_vm1 = vcmp.lt.s32.totalorder %v1464_v31, %v1343_v49  ;;  %v118_v49 = vmin.f32 %v86_v5, 0.9999999  ;;  %v1043_v44 = vpop.eup %1042  ;;  %v119_v2 = vmin.f32 %v87_v29, 0.9999999 }
  0x4a   :  { %vm1685_vm15 = vmand %vm1503_vm12, %vm3354_vm7  ;;  %vm3360_vm7 = vcmp.ne.s32.totalorder %v1386_v62, %v1363_v56  ;;  %vm3363_vm12 = vcmp.ne.s32.totalorder %v1389_v63, %v1363_v56  ;;  %v1045_v5 = vpop.eup %1044  ;;  %v187_v63 = vmul.f32 0.6931472, %v1031_v41  ;;  %v189_v21 = vmul.f32 0.6931472, %v1033_v57 }
  0x4b   :  { %v3356_v37 = vsel %vm1685_vm15, 4294967295, %v3355_v37  ;;  %vm1694_vm5 = vmand %vm3357_vm1, %vm1419_vm2  ;;  %vm3245_vm2 = vcmp.ne.s32.totalorder %v1427_v14, %v1363_v56  ;;  %v1047_v62 = vpop.eup %1046  ;;  %v191_v13 = vmul.f32 0.6931472, %v1035_v12  ;;  %1054 = vlog2.f32 %v117_v40 }
  0x4c   :  { %vm1707_vm15 = vmand %vm1514_vm14, %vm3360_vm7  ;;  %vm3366_vm7 = vcmp.ne.s32.totalorder %v1401_v3, %v1363_v56  ;;  %v1745_v3 = vmul.f32 0.6931472, %v1037_v23  ;;  %v1049_v59 = vpop.eup %1048  ;;  %v1756_v19 = vmul.f32 0.6931472, %v1039_v30  ;;  %v1758_v29 = vmul.f32 0.6931472, %v1041_v45 }
  0x4d   :  { %vm1720_vm10 = vmand %vm1528_vm0, %vm3363_vm12  ;;  %vm3369_vm12 = vcmp.ne.s32.totalorder %v1404_v4, %v1363_v56  ;;  %v1760_v4 = vmul.f32 0.6931472, %v1043_v44  ;;  %1056 = vlog2.f32 %v118_v49  ;;  %vm3375_vm0 = vcmp.ne.s32.totalorder %v1415_v9, %v1363_v56  ;;  %v1051_v23 = vpop.eup %1050 }
  0x4e   :  { %vm1731_vm1 = vmand %vm1544_vm4, %vm3366_vm7  ;;  %vm3372_vm4 = vcmp.ne.s32.totalorder %v1412_v8, %v1363_v56  ;;  %v3376_v28 = vmov 0  ;;  %v1775_v57 = vmul.f32 0.6931472, %v1045_v5  ;;  %v232_v12 = vsub.f32 0.0, %v185_v47  ;;  %v1053_v45 = vpop.eup %1052 }
  0x4f   :  { %vm1741_vm14 = vmand %vm1555_vm8, %vm3369_vm12  ;;  %vm3378_vm12 = vnez %v3332_v42  ;;  %v1788_v36 = vmul.f32 0.6931472, %v1047_v62  ;;  %1058 = vlog2.f32 %v119_v2  ;;  %v233_v40 = vsub.f32 0.0, %v187_v63 }
  0x50   :  { %vm1752_vm7 = vmand %vm1567_vm9, %vm3372_vm4  ;;  %v3387_v42 = vmov 0  ;;  %v1807_v62 = vmul.f32 0.6931472, %v1049_v59  ;;  %v234_v63 = vsub.f32 0.0, %v189_v21  ;;  %v235_v44 = vsub.f32 0.0, %v191_v13 }
  0x51   :  { %vm1771_vm9 = vmand %vm1583_vm13, %vm3375_vm0  ;;  %vm3381_vm13 = vcmp.ne.s32.totalorder %v1430_v15, %v1363_v56  ;;  %vm3382_vm0 = vnez %v3335_v61  ;;  %v236_v47 = vsub.f32 0.0, %v1745_v3  ;;  %v3391_v61 = vmov 0  ;;  %v1055_v2 = vpop.eup %1054 }
  0x52   :  { %v3377_v28 = vsel %vm1771_vm9, 4294967295, %v3376_v28  ;;  %vm1784_vm8 = vmand %vm3378_vm12, %vm3245_vm2  ;;  %vm3385_vm9 = vcmp.ge.s32.totalorder %v1363_v56, 1  ;;  %vm3386_vm12 = vnez %v3338_v0  ;;  %v3393_v59 = vmov 0 }
  0x53   :  { %vm1795_vm4 = vmand %vm3382_vm0, %vm3381_vm13  ;;  %vm3390_vm13 = vcmp.ne.s32.totalorder %v1433_v17, %v1363_v56  ;;  %v237_v0 = vsub.f32 0.0, %v1756_v19  ;;  %v238_v18 = vsub.f32 0.0, %v1758_v29  ;;  %v239_v5 = vsub.f32 0.0, %v1760_v4  ;;  %v1057_v13 = vpop.eup %1056 }
  0x54   :  { %vm1803_vm2 = vmand %vm3386_vm12, %vm3385_vm9  ;;  %v1857_v21 = vmul.f32 0.6931472, %v1051_v23  ;;  %1060 = vlog2.f32 %v232_v12  ;;  %v1882_v29 = vmul.f32 0.6931472, %v1053_v45  ;;  %v241_v34 = vsub.f32 0.0, %v1788_v36 }
  0x55   :  { %v3388_v42 = vsel %vm1803_vm2, 4294967295, %v3387_v42  ;;  %vm1815_vm0 = vmand %vm1632_vm11, %vm3390_vm13  ;;  %v1830_v3 = vsel %vm1803_vm2, %v1230_v50, -1e+30  ;;  %vm3396_vm11 = vcmp.ne.s32.totalorder %v1439_v20, %v1363_v56  ;;  %vm3400_vm2 = vnez %v3350_v33  ;;  %v1059_v23 = vpop.eup %1058 }
  0x56   :  { %3389 = vst [vmem:[#allocation14_spill] sm:$0xff] %v3388_v42  ;;  %v3392_v61 = vsel %vm1815_vm0, 4294967295, %v3391_v61  ;;  %vm1823_vm12 = vmand %vm1643_vm6, %vm3385_vm9  ;;  %vm3397_vm6 = vnez %v3347_v24  ;;  %v3401_v50 = vmov 0  ;;  %v240_v24 = vsub.f32 0.0, %v1775_v57 }
  0x57   :  { %v3394_v59 = vsel %vm1823_vm12, 4294967295, %v3393_v59  ;;  %vm1840_vm13 = vmand %vm3397_vm6, %vm3396_vm11  ;;  %v1855_v4 = vsel %vm1823_vm12, %v1235_v55, -1e+30  ;;  %vm3404_vm11 = vcmp.ne.s32.totalorder %v1447_v25, %v1363_v56  ;;  %v3409_v55 = vmov 0 }
  0x58   :  { %3395 = vst [vmem:[#allocation15_spill] sm:$0xff] %v3394_v59  ;;  %vm1848_vm0 = vmand %vm3400_vm2, %vm3385_vm9  ;;  %1062 = vlog2.f32 %v233_v40  ;;  %v242_v12 = vsub.f32 0.0, %v1807_v62  ;;  %v3419_v10 = vmov 0  ;;  %v1925_v40 = vmul.f32 0.6931472, %v1055_v2 }
  0x59   :  { %v3402_v50 = vsel %vm1848_vm0, 4294967295, %v3401_v50  ;;  %vm1865_vm2 = vmand %vm1672_vm3, %vm3404_vm11  ;;  %v1880_v19 = vsel %vm1848_vm0, %v1242_v60, -1e+30  ;;  %vm3412_vm3 = vcmp.ne.s32.totalorder %v1464_v31, %v1363_v56  ;;  %v3415_v60 = vmov 0 }
  0x5a   :  { %3403 = vst [vmem:[#allocation16_spill] sm:$0xff] %v3402_v50  ;;  %vm3407_vm6 = vmmov %vm3385_vm9  ;;  %vm3408_vm9 = vnez %v3356_v37  ;;  %v614_v58 = vmax.f32 %v1830_v3, %v1880_v19  ;;  %1064 = vlog2.f32 %v234_v63  ;;  %v3423_v53 = vmov 0 }
  0x5b   :  { %vm1873_vm12 = vmand %vm3408_vm9, %vm3407_vm6  ;;  %1066 = vlog2.f32 %v235_v44  ;;  %v1941_v62 = vmul.f32 0.6931472, %v1057_v13  ;;  %v243_v63 = vsub.f32 0.0, %v1857_v21  ;;  %v3427_v7 = vmov 0  ;;  %v1061_v13 = vpop.eup %1060 }
  0x5c   :  { %v3410_v55 = vsel %vm1873_vm12, 4294967295, %v3409_v55  ;;  %vm1890_vm11 = vmand %vm1694_vm5, %vm3412_vm3  ;;  %v1905_v57 = vsel %vm1873_vm12, %v1251_v1, -1e+30  ;;  %v244_v2 = vsub.f32 0.0, %v1882_v29  ;;  %1068 = vlog2.f32 %v236_v47 }
  0x5d   :  { %3411 = vst [vmem:[#allocation17_spill] sm:$0xff] %v3410_v55  ;;  %vm1898_vm9 = vmand %vm1707_vm15, %vm3407_vm6  ;;  %v615_v36 = vmax.f32 %v1855_v4, %v1905_v57  ;;  %v3431_v35 = vmov 0  ;;  %1070 = vlog2.f32 %v237_v0  ;;  %v3436_v41 = vmov 0 }
  0x5e   :  { %v3416_v60 = vsel %vm1898_vm9, 4294967295, %v3415_v60  ;;  %vm3418_vm5 = vmmov %vm3407_vm6  ;;  %v1921_v1 = vsel %vm1898_vm9, %v1260_v6, -1e+30  ;;  %v1063_v47 = vpop.eup %1062  ;;  %1072 = vlog2.f32 %v238_v18  ;;  %v3444_v30 = vmov 0 }
  0x5f   :  { %3417 = vst [vmem:[#allocation18_spill] sm:$0xff] %v3416_v60  ;;  %vm1914_vm15 = vmand %vm1720_vm10, %vm3418_vm5  ;;  %v616_v6 = vmax.f32 %v614_v58, %v1921_v1  ;;  %v1973_v58 = vmul.f32 0.6931472, %v1059_v23  ;;  %v245_v23 = vsub.f32 0.0, %v1925_v40  ;;  %1074 = vlog2.f32 %v239_v5 }
  0x60   :  { %v3420_v10 = vsel %vm1914_vm15, 4294967295, %v3419_v10  ;;  %vm3422_vm3 = vmmov %vm3418_vm5  ;;  %v1938_v45 = vsel %vm1914_vm15, %v1269_v11, -1e+30  ;;  %v1065_v0 = vpop.eup %1064  ;;  %1076 = vlog2.f32 %v240_v24  ;;  %v3449_v5 = vmov 0 }
  0x61   :  { %3421 = vst [vmem:[#allocation19_spill] sm:$0xff] %v3420_v10  ;;  %vm1931_vm6 = vmand %vm1731_vm1, %vm3422_vm3  ;;  %v617_v11 = vmax.f32 %v615_v36, %v1938_v45  ;;  %v1067_v18 = vpop.eup %1066  ;;  %1078 = vlog2.f32 %v241_v34  ;;  %v3457_v26 = vmov 0  ;;  %v3462_v33 = vmov 0 }
  0x62   :  { %v3424_v53 = vsel %vm1931_vm6, 4294967295, %v3423_v53  ;;  %vm3426_vm10 = vmmov %vm3422_vm3  ;;  %v1955_v44 = vsel %vm1931_vm6, %v1278_v16, -1e+30  ;;  %1080 = vlog2.f32 %v242_v12  ;;  %v3489_v10 = vmov 0 }
  0x63   :  { %3425 = vst [vmem:[#allocation20_spill] sm:$0xff] %v3424_v53  ;;  %vm1948_vm5 = vmand %vm1741_vm14, %vm3426_vm10  ;;  %v618_v16 = vmax.f32 %v616_v6, %v1955_v44  ;;  %vm3435_vm10 = vnez %v3377_v28  ;;  %v3440_v28 = vmov 0  ;;  %v246_v6 = vsub.f32 0.0, %v1941_v62 }
  0x64   :  { %v3428_v7 = vsel %vm1948_vm5, 4294967295, %v3427_v7  ;;  %vm3430_vm1 = vmmov %vm3422_vm3  ;;  %v1970_v21 = vsel %vm1948_vm5, %v1287_v22, -1e+30  ;;  %v247_v62 = vsub.f32 0.0, %v1973_v58  ;;  %1082 = vlog2.f32 %v243_v63 }
  0x65   :  { %3429 = vst [vmem:[#allocation21_spill] sm:$0xff] %v3428_v7  ;;  %vm1963_vm3 = vmand %vm1752_vm7, %vm3430_vm1  ;;  %v619_v22 = vmax.f32 %v617_v11, %v1970_v21  ;;  %v281_v11 = vmul.f32 0.6931472, %v1061_v13  ;;  %v1069_v13 = vpop.eup %1068  ;;  %1084 = vlog2.f32 %v244_v2  ;;  %v3491_v60 = vmov 0 }
  0x66   :  { %v3432_v35 = vsel %vm1963_vm3, 4294967295, %v3431_v35  ;;  %vm3434_vm14 = vmmov %vm3430_vm1  ;;  %v1986_v29 = vsel %vm1963_vm3, %v1296_v27, -1e+30  ;;  %v1071_v58 = vpop.eup %1070  ;;  %1086 = vlog2.f32 %v245_v23  ;;  %v3493_v55 = vmov 0 }
  0x67   :  { %3433 = vst [vmem:[#allocation22_spill] sm:$0xff] %v3432_v35  ;;  %vm1979_vm6 = vmand %vm3435_vm10, %vm3434_vm14  ;;  %v620_v27 = vmax.f32 %v618_v16, %v1986_v29  ;;  %v283_v16 = vmul.f32 0.6931472, %v1063_v47  ;;  %v1073_v47 = vpop.eup %1072  ;;  %1088 = vlog2.f32 %v246_v6  ;;  %v3495_v50 = vmov 0 }
  0x68   :  { %v3437_v41 = vsel %vm1979_vm6, 4294967295, %v3436_v41  ;;  %vm3439_vm7 = vmmov %vm3430_vm1  ;;  %v2001_v36 = vsel %vm1979_vm6, %v1305_v32, -1e+30  ;;  %1090 = vlog2.f32 %v247_v62  ;;  %v141_v62 = vld [vmem:[%s3228_s1 + $0xa8] sm:$0xff]  ;;  %v3497_v59 = vmov 0 }
  0x69   :  { %3438 = vst [vmem:[#allocation23_spill] sm:$0xff] %v3437_v41  ;;  %vm1994_vm1 = vmand %vm1784_vm8, %vm3439_vm7  ;;  %v621_v32 = vmax.f32 %v619_v22, %v2001_v36  ;;  %v285_v22 = vmul.f32 0.6931472, %v1065_v0  ;;  %v1075_v0 = vpop.eup %1074  ;;  %v329_v2 = vsub.f32 0.0, %v283_v16  ;;  %v3499_v42 = vmov 0 }
  0x6a   :  { %v3441_v28 = vsel %vm1994_vm1, 4294967295, %v3440_v28  ;;  %vm3443_vm14 = vmmov %vm3439_vm7  ;;  %v2016_v40 = vsel %vm1994_vm1, %v1315_v38, -1e+30 }
  0x6b   :  { %3442 = vst [vmem:[#allocation24_spill] sm:$0xff] %v3441_v28  ;;  %vm2009_vm10 = vmand %vm1795_vm4, %vm3443_vm14  ;;  %v622_v38 = vmax.f32 %v620_v27, %v2016_v40  ;;  %v287_v27 = vmul.f32 0.6931472, %v1067_v18 }
  0x6c   :  { %v3445_v30 = vsel %vm2009_vm10, 4294967295, %v3444_v30  ;;  %vm3447_vm8 = vmmov %vm3439_vm7  ;;  %vm3448_vm7 = vnez %v3392_v61  ;;  %v2030_v49 = vsel %vm2009_vm10, %v1326_v43, -1e+30  ;;  %v3453_v61 = vmov 0 }
  0x6d   :  { %3446 = vst [vmem:[#allocation25_spill] sm:$0xff] %v3445_v30  ;;  %vm2023_vm6 = vmand %vm3448_vm7, %vm3447_vm8  ;;  %v623_v43 = vmax.f32 %v621_v32, %v2030_v49  ;;  %v289_v32 = vmul.f32 0.6931472, %v1069_v13  ;;  %v331_v23 = vsub.f32 0.0, %v287_v27 }
  0x6e   :  { %v3450_v5 = vsel %vm2023_vm6, 4294967295, %v3449_v5  ;;  %vm3452_vm4 = vmmov %vm3447_vm8  ;;  %v2045_v24 = vsel %vm2023_vm6, %v1335_v46, -1e+30 }
  0x6f   :  { %3451 = vst [vmem:[#allocation26_spill] sm:$0xff] %v3450_v5  ;;  %vm2038_vm14 = vmand %vm1840_vm13, %vm3452_vm4  ;;  %v624_v46 = vmax.f32 %v622_v38, %v2045_v24  ;;  %v328_v38 = vsub.f32 0.0, %v281_v11 }
  0x70   :  { %v3454_v61 = vsel %vm2038_vm14, 4294967295, %v3453_v61  ;;  %vm3456_vm8 = vmmov %vm3452_vm4  ;;  %v2059_v34 = vsel %vm2038_vm14, %v1341_v48, -1e+30 }
  0x71   :  { %3455 = vst [vmem:[#allocation27_spill] sm:$0xff] %v3454_v61  ;;  %vm2052_vm7 = vmand %vm1865_vm2, %vm3456_vm8  ;;  %v625_v48 = vmax.f32 %v623_v43, %v2059_v34  ;;  %v1077_v61 = vpop.eup %1076  ;;  %v291_v43 = vmul.f32 0.6931472, %v1071_v58  ;;  %v139_v58 = vld [vmem:[%s3228_s1 + $0x98] sm:$0xff] }
  0x72   :  { %v3458_v26 = vsel %vm2052_vm7, 4294967295, %v3457_v26  ;;  %3460 = vst [vmem:[#allocation29_spill] sm:$0xff] %v2059_v34  ;;  %vm3461_vm13 = vmmov %vm3452_vm4  ;;  %v2073_v12 = vsel %vm2052_vm7, %v1349_v51, -1e+30  ;;  %v136_v51 = vld [vmem:[%s3228_s1 + $0x80] sm:$0xff]  ;;  %v1079_v18 = vpop.eup %1078  ;;  %v3563_v34 = vmov 0 }
  0x73   :  { %3459 = vst [vmem:[#allocation28_spill] sm:$0xff] %v3458_v26  ;;  %vm2066_vm4 = vmand %vm1890_vm11, %vm3461_vm13  ;;  %v626_v37 = vmax.f32 %v624_v46, %v2073_v12  ;;  %v330_v46 = vsub.f32 0.0, %v285_v22  ;;  %v1081_v11 = vpop.eup %1080  ;;  %v295_v26 = vmul.f32 0.6931472, %v1075_v0  ;;  %v297_v30 = vmul.f32 0.6931472, %v1077_v61 }
  0x74   :  { %v3463_v33 = vsel %vm2066_vm4, 4294967295, %v3462_v33  ;;  %3465 = vst [vmem:[#allocation31_spill] sm:$0xff] %v2073_v12  ;;  %v2079_v63 = vsel %vm2066_vm4, %v1361_v54, -1e+30  ;;  %v137_v54 = vld [vmem:[%s3228_s1 + $0x88] sm:$0xff]  ;;  %v1083_v16 = vpop.eup %1082  ;;  %v2097_v6 = vadd.f32 %v328_v38, %v136_v51  ;;  %v333_v41 = vsub.f32 0.0, %v291_v43 }
  0x75   :  { %3464 = vst [vmem:[#allocation30_spill] sm:$0xff] %v3463_v33  ;;  %v627_v5 = vmax.f32 %v625_v48, %v2079_v63  ;;  %v293_v33 = vmul.f32 0.6931472, %v1073_v47  ;;  %v138_v48 = vld [vmem:[%s3228_s1 + $0x90] sm:$0xff]  ;;  %v332_v47 = vsub.f32 0.0, %v289_v32  ;;  %v1085_v22 = vpop.eup %1084  ;;  %v2102_v0 = vadd.f32 %v329_v2, %v137_v54  ;;  %v143_v54 = vld [vmem:[%s3228_s1 + $0xb8] sm:$0xff] }
  0x76   :  { %3466 = vst [vmem:[#allocation32_spill] sm:$0xff] %v2079_v63  ;;  %v301_v27 = vmul.f32 0.6931472, %v1081_v11  ;;  %v2107_v61 = vadd.f32 %v330_v46, %v138_v48  ;;  %v1087_v32 = vpop.eup %1086  ;;  %v142_v51 = vld [vmem:[%s3228_s1 + $0xb0] sm:$0xff]  ;;  %v303_v43 = vmul.f32 0.6931472, %v1083_v16  ;;  %v2134_v16 = vadd.f32 %v333_v41, %v141_v62 }
  0x77   :  { %v628_v13 = vmax.f32 %v626_v37, %v627_v5  ;;  %v140_v5 = vld [vmem:[%s3228_s1 + $0xa0] sm:$0xff]  ;;  %v299_v37 = vmul.f32 0.6931472, %v1079_v18  ;;  %v334_v35 = vsub.f32 0.0, %v293_v33  ;;  %392 = vst [vmem:[%s3230_s3 + $0x80] sm:$0xff] %v2097_v6  ;;  %v335_v2 = vsub.f32 0.0, %v295_v26  ;;  %v1089_v33 = vpop.eup %1088 }
  0x78   :  { %v2116_v18 = vadd.f32 %v331_v23, %v139_v58  ;;  %393 = vst [vmem:[%s3230_s3 + $0x88] sm:$0xff] %v2102_v0  ;;  %v336_v46 = vsub.f32 0.0, %v297_v30  ;;  %v2125_v11 = vadd.f32 %v332_v47, %v140_v5  ;;  %v1091_v26 = vpop.eup %1090  ;;  %v144_v48 = vld [vmem:[%s3228_s1 + $0xc0] sm:$0xff]  ;;  %v145_v30 = vld [vmem:[%s3228_s1 + $0xc8] sm:$0xff]  ;;  %v307_v58 = vmul.f32 0.6931472, %v1087_v32 }
  0x79   :  { %v629_v28 = vrot.slane %v628_v13, 4  ;;  %394 = vst [vmem:[%s3230_s3 + $0x90] sm:$0xff] %v2107_v61  ;;  %v337_v23 = vsub.f32 0.0, %v299_v37  ;;  %v338_v47 = vsub.f32 0.0, %v301_v27  ;;  %v413_v5 = vstv %s2089_s24  ;;  %v146_v37 = vld [vmem:[%s3228_s1 + $0xd0] sm:$0xff] }
  0x7a   :  { %395 = vst [vmem:[%s3230_s3 + $0x98] sm:$0xff] %v2116_v18  ;;  %v309_v62 = vmul.f32 0.6931472, %v1089_v33  ;;  %v339_v7 = vsub.f32 0.0, %v303_v43  ;;  %v2153_v53 = vadd.f32 %v335_v2, %v143_v54  ;;  %v311_v27 = vmul.f32 0.6931472, %v1091_v26 }
  0x7b   :  { %v630_v38 = vmax.f32 %v628_v13, %v629_v28  ;;  %v305_v28 = vmul.f32 0.6931472, %v1085_v22  ;;  %v2143_v22 = vadd.f32 %v334_v35, %v142_v51  ;;  %396 = vst [vmem:[%s3230_s3 + $0xa0] sm:$0xff] %v2125_v11  ;;  %v147_v35 = vld [vmem:[%s3228_s1 + $0xd8] sm:$0xff]  ;;  %v148_v43 = vld [vmem:[%s3228_s1 + $0xe0] sm:$0xff]  ;;  %v2171_v2 = vadd.f32 %v337_v23, %v145_v30  ;;  %v149_v26 = vld [vmem:[%s3228_s1 + $0xe8] sm:$0xff] }
  0x7c   :  { %397 = vst [vmem:[%s3230_s3 + $0xa8] sm:$0xff] %v2134_v16  ;;  %v434_v33 = vperm.slane %v413_v5, 0  ;;  %v341_v54 = vsub.f32 0.0, %v307_v58  ;;  %v150_v23 = vld [vmem:[%s3228_s1 + $0xf0] sm:$0xff]  ;;  %v343_v30 = vsub.f32 0.0, %v311_v27  ;;  %v3616_v12 = vmov 0 }
  0x7d   :  { %v631_v13 = vrot.slane %v630_v38, 2  ;;  %v340_v32 = vsub.f32 0.0, %v305_v28  ;;  %398 = vst [vmem:[%s3230_s3 + $0xb0] sm:$0xff] %v2143_v22  ;;  %v2177_v28 = vadd.f32 %v338_v47, %v146_v37  ;;  %v3472_v27 = vld [vmem:[#allocation9_spill] sm:$0xff]  ;;  %v3525_v47 = vmov 0 }
  0x7e   :  { %399 = vst [vmem:[%s3230_s3 + $0xb8] sm:$0xff] %v2153_v53  ;;  %vm451_vm11 = vcmp.lt.s32.totalorder %v1317_v39, %v434_v33  ;;  %vm2209_vm8 = vcmp.lt.s32.totalorder %v1363_v56, %v434_v33  ;;  %vm452_vm13 = vcmp.lt.s32.totalorder %v1352_v52, %v434_v33  ;;  %vm454_vm7 = vcmp.lt.s32.totalorder %v3472_v27, %v434_v33 }
  0x7f   :  { %v632_v41 = vmax.f32 %v630_v38, %v631_v13  ;;  %v2162_v38 = vadd.f32 %v336_v46, %v144_v48  ;;  %v342_v13 = vsub.f32 0.0, %v309_v62  ;;  %v2188_v48 = vadd.f32 %v339_v7, %v147_v35  ;;  %401 = vst [vmem:[%s3230_s3 + $0xc8] sm:$0xff] %v2171_v2  ;;  %v151_v7 = vld [vmem:[%s3228_s1 + $0xf8] sm:$0xff]  ;;  %v3470_v62 = vld [vmem:[#allocation8_spill] sm:$0xff]  ;;  %vm2244_vm6 = vmand %vm452_vm13, %vm2209_vm8 }
  0x80   :  { %v2197_v58 = vadd.f32 %v340_v32, %v148_v43  ;;  %402 = vst [vmem:[%s3230_s3 + $0xd0] sm:$0xff] %v2177_v28  ;;  %vm453_vm4 = vcmp.lt.s32.totalorder %v3470_v62, %v434_v33  ;;  %v2228_v35 = vadd.f32 %v343_v30, %v151_v7  ;;  %vm2266_vm1 = vmand %vm454_vm7, %vm2209_vm8  ;;  %v3484_v30 = vld [vmem:[#allocation13_spill] sm:$0xff]  ;;  %vm459_vm5 = vcmp.lt.s32.totalorder %v1412_v8, %v434_v33 }
  0x81   :  { %v633_v51 = vrot.slane %v632_v41, 1  ;;  %400 = vst [vmem:[%s3230_s3 + $0xc0] sm:$0xff] %v2162_v38  ;;  %v2225_v37 = vadd.f32 %v342_v13, %v150_v23  ;;  %vm2255_vm10 = vmand %vm453_vm4, %vm2209_vm8  ;;  %v3481_v13 = vld [vmem:[#allocation12_spill] sm:$0xff]  ;;  %vm458_vm3 = vcmp.lt.s32.totalorder %v3484_v30, %v434_v33  ;;  %vm460_vm7 = vcmp.lt.s32.totalorder %v1415_v9, %v434_v33 }
  0x82   :  { %403 = vst [vmem:[%s3230_s3 + $0xd8] sm:$0xff] %v2188_v48  ;;  %vm457_vm13 = vcmp.lt.s32.totalorder %v3481_v13, %v434_v33  ;;  %vm2294_vm12 = vmand %vm458_vm3, %vm2209_vm8  ;;  %vm464_vm3 = vcmp.lt.s32.totalorder %v1439_v20, %v434_v33  ;;  %v3529_v23 = vmov 0  ;;  %v3533_v7 = vmov 0 }
  0x83   :  { %v2183_v46 = vmax.f32 %v632_v41, %v633_v51  ;;  %v2218_v41 = vadd.f32 %v341_v54, %v149_v26  ;;  %404 = vst [vmem:[%s3230_s3 + $0xe0] sm:$0xff] %v2197_v58  ;;  %v3475_v51 = vld [vmem:[#allocation10_spill] sm:$0xff]  ;;  %v3478_v54 = vld [vmem:[#allocation11_spill] sm:$0xff]  ;;  %vm2287_vm9 = vmand %vm457_vm13, %vm2209_vm8  ;;  %v3492_v60 = vsel %vm2294_vm12, 4294967295, %v3491_v60  ;;  %vm463_vm13 = vcmp.lt.s32.totalorder %v1433_v17, %v434_v33 }
  0x84   :  { %3469 = vst [vmem:[#allocation33_spill] sm:$0xff] %v2225_v37  ;;  %vm455_vm14 = vcmp.lt.s32.totalorder %v3475_v51, %v434_v33  ;;  %v3490_v10 = vsel %vm2287_vm9, 4294967295, %v3489_v10  ;;  %vm2301_vm0 = vmand %vm459_vm5, %vm2209_vm8  ;;  %vm465_vm5 = vcmp.lt.s32.totalorder %v1447_v25, %v434_v33  ;;  %v3519_v26 = vmov 0 }
  0x85   :  { %vm926_vm2 = vcmp.gt.f32.partialorder %v2183_v46, -5e+29  ;;  %3471 = vst [vmem:[#allocation8_spill] sm:$0xff] %v2228_v35  ;;  %vm2273_vm4 = vmand %vm455_vm14, %vm2209_vm8  ;;  %vm461_vm14 = vcmp.lt.s32.totalorder %v1427_v14, %v434_v33  ;;  %v3494_v55 = vsel %vm2301_vm0, 4294967295, %v3493_v55  ;;  %v3574_v43 = vmov 0 }
  0x86   :  { %v928_v5 = vsel %vm926_vm2, %v2183_v46, 0.0  ;;  %vm2233_vm2 = vmand %vm451_vm11, %vm2209_vm8  ;;  %405 = vst [vmem:[%s3230_s3 + $0xe8] sm:$0xff] %v2218_v41  ;;  %vm456_vm11 = vcmp.lt.s32.totalorder %v3478_v54, %v434_v33 }
  0x87   :  { %930 = vst [vmem:[#allocation4] sm:$0x1] %v928_v5  ;;  %vm2280_vm15 = vmand %vm456_vm11, %vm2209_vm8  ;;  %vm462_vm11 = vcmp.lt.s32.totalorder %v1430_v15, %v434_v33  ;;  %v3552_v5 = vmov 0 }
  0x88   :  { %406 = vst [vmem:[%s3230_s3 + $0xf0] sm:$0xff] %v2225_v37  ;;  %vm2308_vm9 = vmand %vm460_vm7, %vm2209_vm8  ;;  %vm3501_vm7 = vcmp.ne.s32.totalorder %v1317_v39, %v1363_v56  ;;  %v3522_v37 = vmov 0 }
  0x89   :  { %407 = vst [vmem:[%s3230_s3 + $0xf8] sm:$0xff] %v2228_v35  ;;  %v3496_v50 = vsel %vm2308_vm9, 4294967295, %v3495_v50  ;;  %vm2315_vm12 = vmand %vm461_vm14, %vm2209_vm8  ;;  %vm466_vm14 = vcmp.lt.s32.totalorder %v1464_v31, %v434_v33  ;;  %v3569_v33 = vmov 0  ;;  %v3578_v35 = vmov 0  ;;  %s1133_s3 = smov [#allocation4]  }
  0x8a   :  { %v3498_v59 = vsel %vm2315_vm12, 4294967295, %v3497_v59  ;;  %vm2322_vm0 = vmand %vm462_vm11, %vm2209_vm8  ;;  %vm3506_vm11 = vcmp.ne.s32.totalorder %v1352_v52, %v1363_v56  ;;  %s940_s29 = sshll.u32 %s1133_s3, 4  ;;  %s941_s29 = int_to_ptr.vmem [resolvable:$true] %s940_s29 }
  0x8b   :  { %v3500_v42 = vsel %vm2322_vm0, 4294967295, %v3499_v42  ;;  %vm2331_vm9 = vmand %vm2233_vm2, %vm3501_vm7 }
  0x8c   :  { %vm2338_vm12 = vmand %vm463_vm13, %vm2209_vm8  ;;  %vm3511_vm13 = vcmp.ne.s32.totalorder %v3470_v62, %v1363_v56 }
  0x8d   :  { %vm2347_vm0 = vmand %vm2244_vm6, %vm3506_vm11 }
  0x8e   :  { %vm2353_vm2 = vmand %vm464_vm3, %vm2209_vm8  ;;  %vm3516_vm3 = vcmp.ne.s32.totalorder %v3472_v27, %v1363_v56 }
  0x8f   :  { %vm2362_vm7 = vmand %vm2255_vm10, %vm3511_vm13 }
  0x90   :  { %vm2368_vm6 = vmand %vm465_vm5, %vm2209_vm8  ;;  %vm3521_vm5 = vcmp.ne.s32.totalorder %v3475_v51, %v1363_v56 }
  0x91   :  { %vm2377_vm11 = vmand %vm2266_vm1, %vm3516_vm3  ;;  %vm3524_vm1 = vcmp.ne.s32.totalorder %v3478_v54, %v1363_v56 }
  0x92   :  { %vm2383_vm10 = vmand %vm466_vm14, %vm2209_vm8  ;;  %vm3527_vm8 = vcmp.ne.s32.totalorder %v3481_v13, %v1363_v56  ;;  %vm3528_vm14 = vnez %v3490_v10  ;;  %v3537_v10 = vmov 0 }
  0x93   :  { %v3520_v26 = vsel %vm2383_vm10, 4294967295, %v3519_v26  ;;  %vm2392_vm13 = vmand %vm2273_vm4, %vm3521_vm5  ;;  %vm3531_vm4 = vcmp.ne.s32.totalorder %v3484_v30, %v1363_v56  ;;  %vm3532_vm5 = vnez %v3492_v60  ;;  %v3599_v60 = vmov 0 }
  0x94   :  { %v3523_v37 = vsel %vm2392_vm13, 4294967295, %v3522_v37  ;;  %vm2401_vm3 = vmand %vm2280_vm15, %vm3524_vm1  ;;  %vm3535_vm15 = vcmp.ne.s32.totalorder %v1412_v8, %v1363_v56  ;;  %vm3536_vm1 = vnez %v3494_v55  ;;  %v3603_v55 = vmov 0 }
  0x95   :  { %v3526_v47 = vsel %vm2401_vm3, 4294967295, %v3525_v47  ;;  %vm2410_vm10 = vmand %vm3528_vm14, %vm3527_vm8  ;;  %vm3539_vm8 = vcmp.ne.s32.totalorder %v1415_v9, %v1363_v56  ;;  %vm3540_vm14 = vnez %v3496_v50  ;;  %v3607_v50 = vmov 0 }
  0x96   :  { %v3530_v23 = vsel %vm2410_vm10, 4294967295, %v3529_v23  ;;  %vm2419_vm13 = vmand %vm3532_vm5, %vm3531_vm4  ;;  %vm3543_vm4 = vcmp.ne.s32.totalorder %v1427_v14, %v1363_v56  ;;  %vm3544_vm5 = vnez %v3498_v59  ;;  %v3612_v59 = vmov 0 }
  0x97   :  { %v3534_v7 = vsel %vm2419_vm13, 4294967295, %v3533_v7  ;;  %vm2428_vm3 = vmand %vm3536_vm1, %vm3535_vm15  ;;  %vm3547_vm15 = vcmp.ne.s32.totalorder %v1430_v15, %v1363_v56  ;;  %vm3548_vm1 = vnez %v3500_v42  ;;  %v3558_v42 = vmov 0 }
  0x98   :  { %v3538_v10 = vsel %vm2428_vm3, 4294967295, %v3537_v10  ;;  %vm2437_vm10 = vmand %vm3540_vm14, %vm3539_vm8  ;;  %vm3551_vm8 = vcmp.ge.s32.totalorder %v1363_v56, 1 }
  0x99   :  { %vm2446_vm13 = vmand %vm3544_vm5, %vm3543_vm4  ;;  %vm3554_vm4 = vcmp.ne.s32.totalorder %v1433_v17, %v1363_v56 }
  0x9a   :  { %vm2455_vm3 = vmand %vm3548_vm1, %vm3547_vm15 }
  0x9b   :  { %vm2463_vm14 = vmand %vm2331_vm9, %vm3551_vm8  ;;  %vm3560_vm9 = vcmp.ne.s32.totalorder %v1439_v20, %v1363_v56 }
  0x9c   :  { %v3553_v5 = vsel %vm2463_vm14, 4294967295, %v3552_v5  ;;  %vm2472_vm5 = vmand %vm2338_vm12, %vm3554_vm4  ;;  %v2487_v63 = vsel %vm2463_vm14, %v2097_v6, -1e+30  ;;  %vm3565_vm4 = vcmp.ne.s32.totalorder %v1447_v25, %v1363_v56 }
  0x9d   :  { %vm3557_vm15 = vmmov %vm3551_vm8 }
  0x9e   :  { %vm2480_vm1 = vmand %vm2347_vm0, %vm3557_vm15 }
  0x9f   :  { %v3559_v42 = vsel %vm2480_vm1, 4294967295, %v3558_v42  ;;  %vm2494_vm12 = vmand %vm2353_vm2, %vm3560_vm9  ;;  %v2509_v6 = vsel %vm2480_vm1, %v2102_v0, -1e+30  ;;  %vm3572_vm9 = vcmp.ne.s32.totalorder %v1464_v31, %v1363_v56  ;;  %v3627_v56 = vld [vmem:[#allocation8_spill] sm:$0xff] }
  0xa0   :  { %vm2502_vm0 = vmand %vm2362_vm7, %vm3551_vm8 }
  0xa1   :  { %v3564_v34 = vsel %vm2502_vm0, 4294967295, %v3563_v34  ;;  %vm2516_vm2 = vmand %vm2368_vm6, %vm3565_vm4  ;;  %v2531_v0 = vsel %vm2502_vm0, %v2107_v61, -1e+30  ;;  %vm3573_vm6 = vnez %v3520_v26  ;;  %vm3581_vm0 = vnez %v3526_v47 }
  0xa2   :  { %vm3568_vm15 = vmmov %vm3551_vm8  ;;  %v635_v26 = vmax.f32 %v2487_v63, %v2531_v0 }
  0xa3   :  { %vm2524_vm7 = vmand %vm2377_vm11, %vm3568_vm15  ;;  %vm3577_vm11 = vnez %v3523_v37 }
  0xa4   :  { %v3570_v33 = vsel %vm2524_vm7, 4294967295, %v3569_v33  ;;  %vm2538_vm8 = vmand %vm3573_vm6, %vm3572_vm9  ;;  %v2553_v61 = vsel %vm2524_vm7, %v2116_v18, -1e+30  ;;  %vm656_vm9 = vcmp.ge.f32.partialorder %v1830_v3, %v2183_v46  ;;  %vm3585_vm7 = vnez %v3530_v23 }
  0xa5   :  { %3571 = vst [vmem:[#allocation9_spill] sm:$0xff] %v3570_v33  ;;  %v3575_v43 = vsel %vm2538_vm8, 4294967295, %v3574_v43  ;;  %vm3576_vm4 = vmmov %vm3568_vm15  ;;  %v636_v18 = vmax.f32 %v2509_v6, %v2553_v61  ;;  %v3586_v3 = vmov 0 }
  0xa6   :  { %vm2546_vm15 = vmand %vm3577_vm11, %vm3576_vm4 }
  0xa7   :  { %v3579_v35 = vsel %vm2546_vm15, 4294967295, %v3578_v35  ;;  %vm3580_vm6 = vmmov %vm3576_vm4  ;;  %v2570_v33 = vsel %vm2546_vm15, %v2125_v11, -1e+30  ;;  %vm657_vm4 = vcmp.ge.f32.partialorder %v1855_v4, %v2183_v46  ;;  %vm3589_vm15 = vnez %v3534_v7 }
  0xa8   :  { %vm2563_vm1 = vmand %vm3581_vm0, %vm3580_vm6  ;;  %v637_v11 = vmax.f32 %v635_v26, %v2570_v33  ;;  %v688_v26 = vsel %vm656_vm9, %v1317_v39, 128  ;;  %vm3593_vm0 = vnez %v3538_v10 }
  0xa9   :  { %vm3584_vm11 = vmmov %vm3580_vm6  ;;  %v2587_v47 = vsel %vm2563_vm1, %v2134_v16, -1e+30 }
  0xaa   :  { %vm2580_vm14 = vmand %vm3585_vm7, %vm3584_vm11  ;;  %v638_v16 = vmax.f32 %v636_v18, %v2587_v47  ;;  %vm659_vm7 = vcmp.ge.f32.partialorder %v1905_v57, %v2183_v46 }
  0xab   :  { %v3587_v3 = vsel %vm2580_vm14, 4294967295, %v3586_v3  ;;  %vm2596_vm8 = vmand %vm3589_vm15, %vm3580_vm6  ;;  %v2603_v23 = vsel %vm2580_vm14, %v2143_v22, -1e+30 }
  0xac   :  { %3588 = vst [vmem:[#allocation10_spill] sm:$0xff] %v3587_v3  ;;  %vm3592_vm11 = vmmov %vm3580_vm6  ;;  %v2620_v22 = vsel %vm2596_vm8, %v2153_v53, -1e+30  ;;  %v639_v18 = vmax.f32 %v637_v11, %v2603_v23  ;;  %v689_v3 = vsel %vm657_vm4, %v1352_v52, 128  ;;  %vm3610_vm4 = vcmp.ge.f32.partialorder %v1880_v19, %v2183_v46 }
  0xad   :  { %vm2613_vm15 = vmand %vm3593_vm0, %vm3592_vm11  ;;  %v640_v11 = vmax.f32 %v638_v16, %v2620_v22  ;;  %v691_v19 = vsel %vm659_vm7, %v3472_v27, 128  ;;  %vm3620_vm7 = vcmp.ge.f32.partialorder %v1938_v45, %v2183_v46 }
  0xae   :  { %vm3596_vm9 = vmmov %vm3580_vm6  ;;  %v2637_v53 = vsel %vm2613_vm15, %v2162_v38, -1e+30  ;;  %v693_v32 = vsel %vm3620_vm7, %v3478_v54, 128 }
  0xaf   :  { %vm2630_vm0 = vmand %vm2437_vm10, %vm3596_vm9  ;;  %v641_v16 = vmax.f32 %v639_v18, %v2637_v53 }
  0xb0   :  { %vm2648_vm10 = vmand %vm2446_vm13, %vm3580_vm6  ;;  %v2655_v38 = vsel %vm2630_vm0, %v2171_v2, -1e+30 }
  0xb1   :  { %v3600_v60 = vsel %vm2648_vm10, 4294967295, %v3599_v60  ;;  %vm3602_vm11 = vmmov %vm3580_vm6  ;;  %v2673_v2 = vsel %vm2648_vm10, %v2177_v28, -1e+30  ;;  %v642_v18 = vmax.f32 %v640_v11, %v2655_v38 }
  0xb2   :  { %3601 = vst [vmem:[#allocation11_spill] sm:$0xff] %v3600_v60  ;;  %vm2666_vm13 = vmand %vm2455_vm3, %vm3602_vm11  ;;  %v643_v11 = vmax.f32 %v641_v16, %v2673_v2  ;;  %v690_v60 = vsel %vm3610_vm4, %v3470_v62, 128 }
  0xb3   :  { %v3604_v55 = vsel %vm2666_vm13, 4294967295, %v3603_v55  ;;  %vm3606_vm9 = vmmov %vm3580_vm6  ;;  %v2691_v28 = vsel %vm2666_vm13, %v2188_v48, -1e+30  ;;  %vm720_vm7 = vcmp.lt.s32.totalorder %v688_v26, %v690_v60 }
  0xb4   :  { %3605 = vst [vmem:[#allocation12_spill] sm:$0xff] %v3604_v55  ;;  %vm2684_vm3 = vmand %vm2472_vm5, %vm3606_vm9  ;;  %v644_v16 = vmax.f32 %v642_v18, %v2691_v28  ;;  %v721_v55 = vsel %vm720_vm7, %v688_v26, %v690_v60 }
  0xb5   :  { %v3608_v50 = vsel %vm2684_vm3, 4294967295, %v3607_v50  ;;  %vm3611_vm5 = vmmov %vm3580_vm6  ;;  %v2711_v48 = vsel %vm2684_vm3, %v2197_v58, -1e+30 }
  0xb6   :  { %3609 = vst [vmem:[#allocation13_spill] sm:$0xff] %v3608_v50  ;;  %vm2704_vm9 = vmand %vm2494_vm12, %vm3611_vm5  ;;  %v645_v18 = vmax.f32 %v643_v11, %v2711_v48 }
  0xb7   :  { %v3613_v59 = vsel %vm2704_vm9, 4294967295, %v3612_v59  ;;  %vm3615_vm12 = vmmov %vm3611_vm5  ;;  %v2731_v58 = vsel %vm2704_vm9, %v2218_v41, -1e+30  ;;  %vm3619_vm5 = vcmp.ge.f32.partialorder %v1921_v1, %v2183_v46  ;;  %v3625_v41 = vld [vmem:[#allocation33_spill] sm:$0xff] }
  0xb8   :  { %3614 = vst [vmem:[#allocation34_spill] sm:$0xff] %v3613_v59  ;;  %vm2724_vm4 = vmand %vm2516_vm2, %vm3615_vm12  ;;  %v692_v57 = vsel %vm3619_vm5, %v3475_v51, 128  ;;  %vm3622_vm12 = vnez %v3575_v43  ;;  %v3623_v59 = vmov 0  ;;  %v646_v1 = vmax.f32 %v644_v16, %v2731_v58 }
  0xb9   :  { %v3617_v12 = vsel %vm2724_vm4, 4294967295, %v3616_v12  ;;  %vm3621_vm2 = vmmov %vm3580_vm6  ;;  %v2753_v11 = vsel %vm2724_vm4, %v3625_v41, -1e+30  ;;  %vm3626_vm5 = vcmp.ge.f32.partialorder %v1955_v44, %v2183_v46  ;;  %vm724_vm6 = vcmp.lt.s32.totalorder %v721_v55, %v692_v57  ;;  %v3629_v44 = vld [vmem:[#allocation29_spill] sm:$0xff] }
  0xba   :  { %3618 = vst [vmem:[#allocation35_spill] sm:$0xff] %v3617_v12  ;;  %vm2746_vm11 = vmand %vm3622_vm12, %vm3621_vm2  ;;  %v694_v45 = vsel %vm3626_vm5, %v3481_v13, 128  ;;  %v647_v50 = vmax.f32 %v645_v18, %v2753_v11  ;;  %vm722_vm2 = vcmp.lt.s32.totalorder %v689_v3, %v691_v19  ;;  %vm3628_vm12 = vcmp.ge.f32.partialorder %v1970_v21, %v2183_v46 }
  0xbb   :  { %v3624_v59 = vsel %vm2746_vm11, 4294967295, %v3623_v59  ;;  %v2763_v43 = vsel %vm2746_vm11, %v3627_v56, -1e+30  ;;  %v695_v16 = vsel %vm3628_vm12, %v3484_v30, 128  ;;  %v723_v12 = vsel %vm722_vm2, %v689_v3, %v691_v19  ;;  %v3632_v3 = vld [vmem:[#allocation31_spill] sm:$0xff] }
  0xbc   :  { %v648_v41 = vmax.f32 %v646_v1, %v2763_v43  ;;  %vm3630_vm11 = vcmp.ge.f32.partialorder %v1986_v29, %v2183_v46  ;;  %v725_v18 = vsel %vm724_vm6, %v721_v55, %v692_v57  ;;  %vm726_vm7 = vcmp.lt.s32.totalorder %v723_v12, %v693_v32 }
  0xbd   :  { %v696_v56 = vsel %vm3630_vm11, %v1412_v8, 128  ;;  %vm3631_vm4 = vcmp.ge.f32.partialorder %v2001_v36, %v2183_v46  ;;  %v727_v21 = vsel %vm726_vm7, %v723_v12, %v693_v32  ;;  %vm728_vm12 = vcmp.lt.s32.totalorder %v725_v18, %v694_v45  ;;  %v3635_v12 = vld [vmem:[#allocation32_spill] sm:$0xff] }
  0xbe   :  { %v649_v26 = vmax.f32 %v647_v50, %v648_v41  ;;  %v697_v60 = vsel %vm3631_vm4, %v1415_v9, 128  ;;  %vm3633_vm5 = vcmp.ge.f32.partialorder %v2016_v40, %v2183_v46  ;;  %v729_v29 = vsel %vm728_vm12, %v725_v18, %v694_v45 }
  0xbf   :  { %v698_v19 = vsel %vm3633_vm5, %v1427_v14, 128  ;;  %vm730_vm11 = vcmp.lt.s32.totalorder %v727_v21, %v695_v16  ;;  %vm3634_vm6 = vcmp.ge.f32.partialorder %v2030_v49, %v2183_v46  ;;  %vm732_vm4 = vcmp.lt.s32.totalorder %v729_v29, %v696_v56 }
  0xc0   :  { %v650_v55 = vrot.slane %v649_v26, 4  ;;  %v699_v50 = vsel %vm3634_vm6, %v1430_v15, 128  ;;  %v731_v36 = vsel %vm730_vm11, %v727_v21, %v695_v16  ;;  %vm671_vm7 = vcmp.ge.f32.partialorder %v3635_v12, %v2183_v46 }
  0xc1   :  { %vm3636_vm2 = vcmp.ge.f32.partialorder %v2045_v24, %v2183_v46  ;;  %v733_v40 = vsel %vm732_vm4, %v729_v29, %v696_v56  ;;  %vm734_vm5 = vcmp.lt.s32.totalorder %v731_v36, %v697_v60  ;;  %vm3637_vm12 = vcmp.ge.f32.partialorder %v3629_v44, %v2183_v46  ;;  %v3709_v37 = vld [vmem:[#allocation35_spill] sm:$0xff] }
  0xc2   :  { %v700_v57 = vsel %vm3636_vm2, %v1433_v17, 128  ;;  %v651_v32 = vmax.f32 %v649_v26, %v650_v55  ;;  %v701_v1 = vsel %vm3637_vm12, %v1439_v20, 128  ;;  %v735_v49 = vsel %vm734_vm5, %v731_v36, %v697_v60 }
  0xc3   :  { %vm736_vm6 = vcmp.lt.s32.totalorder %v733_v40, %v698_v19  ;;  %vm3638_vm11 = vcmp.ge.f32.partialorder %v3632_v3, %v2183_v46  ;;  %vm738_vm9 = vcmp.lt.s32.totalorder %v735_v49, %v699_v50  ;;  %v703_v24 = vsel %vm671_vm7, %v1464_v31, 128 }
  0xc4   :  { %v702_v45 = vsel %vm3638_vm11, %v1447_v25, 128  ;;  %v737_v41 = vsel %vm736_vm6, %v733_v40, %v698_v19  ;;  %v652_v16 = vrot.slane %v651_v32, 2  ;;  %v739_v56 = vsel %vm738_vm9, %v735_v49, %v699_v50 }
  0xc5   :  { %vm740_vm2 = vcmp.lt.s32.totalorder %v737_v41, %v700_v57  ;;  %vm742_vm4 = vcmp.lt.s32.totalorder %v739_v56, %v701_v1 }
  0xc6   :  { %v741_v18 = vsel %vm740_vm2, %v737_v41, %v700_v57  ;;  %v653_v26 = vmax.f32 %v651_v32, %v652_v16  ;;  %v743_v21 = vsel %vm742_vm4, %v739_v56, %v701_v1  ;;  %v3649_v16 = vld [vmem:[#allocation15_spill] sm:$0xff] }
  0xc7   :  { %vm744_vm3 = vcmp.lt.s32.totalorder %v741_v18, %v702_v45  ;;  %vm746_vm5 = vcmp.lt.s32.totalorder %v743_v21, %v703_v24 }
  0xc8   :  { %v745_v44 = vsel %vm744_vm3, %v741_v18, %v702_v45  ;;  %v654_v60 = vrot.slane %v653_v26, 1  ;;  %v747_v29 = vsel %vm746_vm5, %v743_v21, %v703_v24  ;;  %v3651_v24 = vld [vmem:[#allocation16_spill] sm:$0xff] }
  0xc9   :  { %vm748_vm12 = vcmp.lt.s32.totalorder %v745_v44, %v747_v29 }
  0xca   :  { %v2809_v46 = vmax.f32 %v653_v26, %v654_v60  ;;  %v749_v3 = vsel %vm748_vm12, %v745_v44, %v747_v29  ;;  %v3656_v26 = vld [vmem:[#allocation17_spill] sm:$0xff]  ;;  %v3660_v44 = vld [vmem:[#allocation18_spill] sm:$0xff]  ;;  %v3663_v29 = vld [vmem:[#allocation19_spill] sm:$0xff] }
  0xcb   :  { %v750_v19 = vrot.slane %v749_v3, 4 }
  0xcc   :  { %vm927_vm9 = vcmp.gt.f32.partialorder %v2809_v46, -5e+29  ;;  %vm672_vm7 = vcmp.ge.f32.partialorder %v2487_v63, %v2809_v46  ;;  %vm674_vm11 = vcmp.ge.f32.partialorder %v2531_v0, %v2809_v46  ;;  %vm681_vm2 = vcmp.ge.f32.partialorder %v2655_v38, %v2809_v46 }
  0xcd   :  { %v929_v55 = vsel %vm927_vm9, %v2809_v46, 0.0  ;;  %vm751_vm3 = vcmp.lt.s32.totalorder %v749_v3, %v750_v19  ;;  %vm682_vm4 = vcmp.ge.f32.partialorder %v2673_v2, %v2809_v46  ;;  %vm684_vm9 = vcmp.ge.f32.partialorder %v2711_v48, %v2809_v46 }
  0xce   :  { %931 = vst [vmem:[#allocation4 + $0x1] sm:$0x1] %v929_v55  ;;  %v752_v50 = vsel %vm751_vm3, %v749_v3, %v750_v19  ;;  %v704_v40 = vsel %vm672_vm7, %v1317_v39, 128  ;;  %vm3639_vm5 = vcmp.ge.f32.partialorder %v2509_v6, %v2809_v46  ;;  %v706_v1 = vsel %vm674_vm11, %v3470_v62, 128  ;;  %v3665_v19 = vld [vmem:[#allocation20_spill] sm:$0xff] }
  0xcf   :  { %v753_v36 = vrot.slane %v752_v50, 2  ;;  %948 = dma.vmem_to_hbm [thread:$0]  %s941_s29, 32, %s943_s7, [#allocation5], %s1134_s5, %s1134_s5, %s1135_s8   ;;  %v705_v32 = vsel %vm3639_vm5, %v1352_v52, 128  ;;  %vm3641_vm7 = vcmp.ge.f32.partialorder %v2570_v33, %v2809_v46  ;;  %vm3642_vm5 = vcmp.ge.f32.partialorder %v2587_v47, %v2809_v46 }
  0xd0   :  { %v708_v63 = vsel %vm3641_vm7, %v3475_v51, 128  ;;  %v709_v6 = vsel %vm3642_vm5, %v3478_v54, 128  ;;  %vm3643_vm11 = vcmp.ge.f32.partialorder %v2603_v23, %v2809_v46  ;;  %vm3645_vm7 = vcmp.ge.f32.partialorder %v2637_v53, %v2809_v46  ;;  %v3646_v23 = vld [vmem:[#allocation14_spill] sm:$0xff] }
  0xd1   :  { %vm754_vm12 = vcmp.lt.s32.totalorder %v752_v50, %v753_v36  ;;  %v710_v0 = vsel %vm3643_vm11, %v3481_v13, 128  ;;  %v2883_v33 = vsel %vm3645_vm7, %v1412_v8, 128  ;;  %v2895_v47 = vsel %vm681_vm2, %v1415_v9, 128 }
  0xd2   :  { %v755_v12 = vsel %vm754_vm12, %v752_v50, %v753_v36  ;;  %vm3640_vm12 = vcmp.ge.f32.partialorder %v2553_v61, %v2809_v46  ;;  %vm3648_vm11 = vcmp.ge.f32.partialorder %v2691_v28, %v2809_v46  ;;  %vm759_vm2 = vcmp.lt.s32.totalorder %v704_v40, %v706_v1  ;;  %v3668_v36 = vld [vmem:[#allocation21_spill] sm:$0xff] }
  0xd3   :  { %v756_v57 = vrot.slane %v755_v12, 1  ;;  %v707_v49 = vsel %vm3640_vm12, %v3472_v27, 128  ;;  %vm3644_vm12 = vcmp.ge.f32.partialorder %v2620_v22, %v2809_v46  ;;  %v2905_v22 = vsel %vm682_vm4, %v1427_v14, 128 }
  0xd4   :  { %v711_v61 = vsel %vm3644_vm12, %v3484_v30, 128  ;;  %vm3647_vm12 = vnez %v3646_v23  ;;  %v2911_v53 = vsel %vm3648_vm11, %v1430_v15, 128  ;;  %v1136_v38 = vmov 0.0   ;;  %v3680_v23 = vld [vmem:[#allocation25_spill] sm:$0xff] }
  0xd5   :  { %vm757_vm3 = vcmp.lt.s32.totalorder %v755_v12, %v756_v57  ;;  %v2922_v2 = vsel %vm684_vm9, %v1433_v17, 128  ;;  %vm3654_vm9 = vcmp.ge.f32.partialorder %v2731_v58, %v2809_v46  ;;  %vm3655_vm4 = vcmp.ge.f32.partialorder %v2753_v11, %v2809_v46 }
  0xd6   :  { %v2869_v45 = vsel %vm757_vm3, %v755_v12, %v756_v57  ;;  %v2939_v48 = vsel %vm3654_vm9, %v1439_v20, 128  ;;  %v2945_v56 = vsel %vm3655_vm4, %v1447_v25, 128  ;;  %vm3659_vm4 = vcmp.ge.f32.partialorder %v2763_v43, %v2809_v46 }
  0xd7   :  { %vm798_vm3 = vcmp.eq.s32.totalorder %v1317_v39, %v2869_v45  ;;  %vm799_vm5 = vcmp.eq.s32.totalorder %v1352_v52, %v2869_v45  ;;  %vm802_vm7 = vcmp.eq.s32.totalorder %v3475_v51, %v2869_v45  ;;  %v2962_v58 = vsel %vm3659_vm4, %v1464_v31, 128 }
  0xd8   :  { %vm830_vm6 = vmand %vm798_vm3, %vm3647_vm12  ;;  %vm3650_vm3 = vnez %v3649_v16  ;;  %v760_v11 = vsel %vm759_vm2, %v704_v40, %v706_v1  ;;  %vm3662_vm9 = vcmp.lt.s32.totalorder %v705_v32, %v707_v49  ;;  %vm3664_vm2 = vnez %v3663_v29  ;;  %v3671_v40 = vld [vmem:[#allocation22_spill] sm:$0xff] }
  0xd9   :  { %v862_v41 = vsel %vm830_vm6, 1.0, %v1136_v38  ;;  %vm831_vm12 = vmand %vm799_vm5, %vm3650_vm3  ;;  %vm3652_vm6 = vnez %v3651_v24  ;;  %vm3653_vm5 = vcmp.eq.s32.totalorder %v3470_v62, %v2869_v45  ;;  %vm803_vm3 = vcmp.eq.s32.totalorder %v3478_v54, %v2869_v45  ;;  %v3683_v16 = vld [vmem:[#allocation26_spill] sm:$0xff]  ;;  %v3686_v24 = vld [vmem:[#allocation27_spill] sm:$0xff] }
  0xda   :  { %894 = vst [vmem:[%s3231_s4] sm:$0xff] %v862_v41  ;;  %v863_v28 = vsel %vm831_vm12, 1.0, %v1136_v38  ;;  %vm832_vm11 = vmand %vm3653_vm5, %vm3652_vm6  ;;  %vm3657_vm12 = vnez %v3656_v26  ;;  %vm3658_vm6 = vcmp.eq.s32.totalorder %v3472_v27, %v2869_v45  ;;  %v762_v43 = vsel %vm3662_vm9, %v705_v32, %v707_v49  ;;  %v3674_v49 = vld [vmem:[#allocation23_spill] sm:$0xff]  ;;  %v3689_v26 = vld [vmem:[#allocation28_spill] sm:$0xff] }
  0xdb   :  { %895 = vst [vmem:[%s3231_s4 + $0x8] sm:$0xff] %v863_v28  ;;  %v864_v18 = vsel %vm832_vm11, 1.0, %v1136_v38  ;;  %vm833_vm5 = vmand %vm3658_vm6, %vm3657_vm12  ;;  %vm3661_vm11 = vnez %v3660_v44  ;;  %vm763_vm4 = vcmp.lt.s32.totalorder %v760_v11, %v708_v63  ;;  %vm3666_vm9 = vnez %v3665_v19 }
  0xdc   :  { %896 = vst [vmem:[%s3231_s4 + $0x10] sm:$0xff] %v864_v18  ;;  %v865_v21 = vsel %vm833_vm5, 1.0, %v1136_v38  ;;  %vm834_vm12 = vmand %vm802_vm7, %vm3661_vm11  ;;  %v764_v46 = vsel %vm763_vm4, %v760_v11, %v708_v63  ;;  %vm765_vm11 = vcmp.lt.s32.totalorder %v762_v43, %v709_v6  ;;  %vm3669_vm4 = vnez %v3668_v36 }
  0xdd   :  { %897 = vst [vmem:[%s3231_s4 + $0x18] sm:$0xff] %v865_v21  ;;  %v866_v60 = vsel %vm834_vm12, 1.0, %v1136_v38  ;;  %vm835_vm5 = vmand %vm803_vm3, %vm3664_vm2  ;;  %vm3667_vm12 = vcmp.eq.s32.totalorder %v3481_v13, %v2869_v45  ;;  %v766_v55 = vsel %vm765_vm11, %v762_v43, %v709_v6  ;;  %vm767_vm2 = vcmp.lt.s32.totalorder %v764_v46, %v710_v0  ;;  %v3692_v21 = vld [vmem:[#allocation30_spill] sm:$0xff] }
  0xde   :  { %898 = vst [vmem:[%s3231_s4 + $0x20] sm:$0xff] %v866_v60  ;;  %v867_v3 = vsel %vm835_vm5, 1.0, %v1136_v38  ;;  %vm836_vm6 = vmand %vm3667_vm12, %vm3666_vm9  ;;  %vm3670_vm5 = vcmp.eq.s32.totalorder %v3484_v30, %v2869_v45  ;;  %v768_v12 = vsel %vm767_vm2, %v764_v46, %v710_v0  ;;  %vm769_vm12 = vcmp.lt.s32.totalorder %v766_v55, %v711_v61  ;;  %v3677_v0 = vld [vmem:[#allocation24_spill] sm:$0xff] }
  0xdf   :  { %899 = vst [vmem:[%s3231_s4 + $0x28] sm:$0xff] %v867_v3  ;;  %v868_v50 = vsel %vm836_vm6, 1.0, %v1136_v38  ;;  %vm837_vm7 = vmand %vm3670_vm5, %vm3669_vm4  ;;  %vm3672_vm11 = vnez %v3671_v40  ;;  %vm3673_vm6 = vcmp.eq.s32.totalorder %v1412_v8, %v2869_v45  ;;  %v770_v32 = vsel %vm769_vm12, %v766_v55, %v711_v61 }
  0xe0   :  { %900 = vst [vmem:[%s3231_s4 + $0x30] sm:$0xff] %v868_v50  ;;  %v869_v57 = vsel %vm837_vm7, 1.0, %v1136_v38  ;;  %vm838_vm3 = vmand %vm3673_vm6, %vm3672_vm11  ;;  %vm771_vm5 = vcmp.lt.s32.totalorder %v768_v12, %v2883_v33  ;;  %vm3675_vm7 = vnez %v3674_v49  ;;  %vm3676_vm2 = vcmp.eq.s32.totalorder %v1415_v9, %v2869_v45 }
  0xe1   :  { %901 = vst [vmem:[%s3231_s4 + $0x38] sm:$0xff] %v869_v57  ;;  %v870_v1 = vsel %vm838_vm3, 1.0, %v1136_v38  ;;  %vm839_vm9 = vmand %vm3676_vm2, %vm3675_vm7  ;;  %v772_v63 = vsel %vm771_vm5, %v768_v12, %v2883_v33  ;;  %vm773_vm12 = vcmp.lt.s32.totalorder %v770_v32, %v2895_v47  ;;  %vm3678_vm3 = vnez %v3677_v0 }
  0xe2   :  { %902 = vst [vmem:[%s3231_s4 + $0x40] sm:$0xff] %v870_v1  ;;  %v871_v6 = vsel %vm839_vm9, 1.0, %v1136_v38  ;;  %vm3679_vm6 = vcmp.eq.s32.totalorder %v1427_v14, %v2869_v45  ;;  %v774_v61 = vsel %vm773_vm12, %v770_v32, %v2895_v47  ;;  %vm775_vm5 = vcmp.lt.s32.totalorder %v772_v63, %v2905_v22 }
  0xe3   :  { %vm840_vm4 = vmand %vm3679_vm6, %vm3678_vm3  ;;  %903 = vst [vmem:[%s3231_s4 + $0x48] sm:$0xff] %v871_v6  ;;  %vm3681_vm9 = vnez %v3680_v23  ;;  %vm3682_vm2 = vcmp.eq.s32.totalorder %v1430_v15, %v2869_v45  ;;  %v776_v41 = vsel %vm775_vm5, %v772_v63, %v2905_v22  ;;  %vm777_vm12 = vcmp.lt.s32.totalorder %v774_v61, %v2911_v53 }
  0xe4   :  { %v872_v33 = vsel %vm840_vm4, 1.0, %v1136_v38  ;;  %vm841_vm11 = vmand %vm3682_vm2, %vm3681_vm9  ;;  %vm3684_vm4 = vnez %v3683_v16  ;;  %vm3685_vm6 = vcmp.eq.s32.totalorder %v1433_v17, %v2869_v45  ;;  %vm813_vm9 = vcmp.eq.s32.totalorder %v1464_v31, %v2869_v45 }
  0xe5   :  { %904 = vst [vmem:[%s3231_s4 + $0x50] sm:$0xff] %v872_v33  ;;  %v873_v47 = vsel %vm841_vm11, 1.0, %v1136_v38  ;;  %vm842_vm7 = vmand %vm3685_vm6, %vm3684_vm4  ;;  %v778_v28 = vsel %vm777_vm12, %v774_v61, %v2911_v53  ;;  %vm779_vm5 = vcmp.lt.s32.totalorder %v776_v41, %v2922_v2  ;;  %vm3687_vm11 = vnez %v3686_v24 }
  0xe6   :  { %905 = vst [vmem:[%s3231_s4 + $0x58] sm:$0xff] %v873_v47  ;;  %v874_v22 = vsel %vm842_vm7, 1.0, %v1136_v38  ;;  %vm3688_vm2 = vcmp.eq.s32.totalorder %v1439_v20, %v2869_v45  ;;  %v780_v18 = vsel %vm779_vm5, %v776_v41, %v2922_v2  ;;  %vm781_vm4 = vcmp.lt.s32.totalorder %v778_v28, %v2939_v48 }
  0xe7   :  { %vm843_vm3 = vmand %vm3688_vm2, %vm3687_vm11  ;;  %906 = vst [vmem:[%s3231_s4 + $0x60] sm:$0xff] %v874_v22  ;;  %vm3690_vm12 = vnez %v3689_v26  ;;  %vm3691_vm7 = vcmp.eq.s32.totalorder %v1447_v25, %v2869_v45  ;;  %v782_v11 = vsel %vm781_vm4, %v778_v28, %v2939_v48  ;;  %vm783_vm11 = vcmp.lt.s32.totalorder %v780_v18, %v2945_v56 }
  0xe8   :  { %v875_v53 = vsel %vm843_vm3, 1.0, %v1136_v38  ;;  %vm844_vm6 = vmand %vm3691_vm7, %vm3690_vm12  ;;  %vm3693_vm5 = vnez %v3692_v21  ;;  %v784_v44 = vsel %vm783_vm11, %v780_v18, %v2945_v56  ;;  %vm785_vm2 = vcmp.lt.s32.totalorder %v782_v11, %v2962_v58 }
  0xe9   :  { %907 = vst [vmem:[%s3231_s4 + $0x68] sm:$0xff] %v875_v53  ;;  %v876_v2 = vsel %vm844_vm6, 1.0, %v1136_v38  ;;  %vm845_vm3 = vmand %vm813_vm9, %vm3693_vm5  ;;  %v786_v43 = vsel %vm785_vm2, %v782_v11, %v2962_v58 }
  0xea   :  { %908 = vst [vmem:[%s3231_s4 + $0x70] sm:$0xff] %v876_v2  ;;  %v877_v48 = vsel %vm845_vm3, 1.0, %v1136_v38  ;;  %vm787_vm4 = vcmp.lt.s32.totalorder %v784_v44, %v786_v43  ;;  %vm3694_vm3 = vnez %v3553_v5  ;;  %v3701_v5 = vld [vmem:[#allocation11_spill] sm:$0xff] }
  0xeb   :  { %909 = vst [vmem:[%s3231_s4 + $0x78] sm:$0xff] %v877_v48  ;;  %v788_v60 = vsel %vm787_vm4, %v784_v44, %v786_v43 }
  0xec   :  { %v789_v45 = vrot.slane %v788_v60, 4 }
  0xee   :  { %vm790_vm9 = vcmp.lt.s32.totalorder %v788_v60, %v789_v45 }
  0xef   :  { %v791_v29 = vsel %vm790_vm9, %v788_v60, %v789_v45  ;;  %vm3695_vm9 = vnez %v3559_v42  ;;  %v3703_v42 = vld [vmem:[#allocation12_spill] sm:$0xff] }
  0xf0   :  { %v792_v56 = vrot.slane %v791_v29, 2 }
  0xf2   :  { %vm793_vm12 = vcmp.lt.s32.totalorder %v791_v29, %v792_v56 }
  0xf3   :  { %v794_v46 = vsel %vm793_vm12, %v791_v29, %v792_v56 }
  0xf4   :  { %v795_v3 = vrot.slane %v794_v46, 1 }
  0xf6   :  { %vm796_vm7 = vcmp.lt.s32.totalorder %v794_v46, %v795_v3 }
  0xf7   :  { %v797_v19 = vsel %vm796_vm7, %v794_v46, %v795_v3  ;;  %vm3696_vm7 = vnez %v3564_v34  ;;  %v3705_v34 = vld [vmem:[#allocation13_spill] sm:$0xff] }
  0xf8   :  { %vm814_vm6 = vcmp.eq.s32.totalorder %v1317_v39, %v797_v19  ;;  %vm815_vm11 = vcmp.eq.s32.totalorder %v1352_v52, %v797_v19  ;;  %vm816_vm5 = vcmp.eq.s32.totalorder %v3470_v62, %v797_v19  ;;  %vm817_vm4 = vcmp.eq.s32.totalorder %v3472_v27, %v797_v19  ;;  %v3697_v62 = vld [vmem:[#allocation9_spill] sm:$0xff] }
  0xf9   :  { %vm846_vm2 = vmand %vm814_vm6, %vm3694_vm3  ;;  %vm818_vm12 = vcmp.eq.s32.totalorder %v3475_v51, %v797_v19  ;;  %vm819_vm6 = vcmp.eq.s32.totalorder %v3478_v54, %v797_v19 }
  0xfa   :  { %v878_v58 = vsel %vm846_vm2, 1.0, %v1136_v38  ;;  %vm847_vm13 = vmand %vm815_vm11, %vm3695_vm9  ;;  %vm3698_vm11 = vnez %v3697_v62  ;;  %vm820_vm2 = vcmp.eq.s32.totalorder %v3481_v13, %v797_v19  ;;  %vm821_vm9 = vcmp.eq.s32.totalorder %v3484_v30, %v797_v19 }
  0xfb   :  { %910 = vst [vmem:[%s3231_s4 + $0x80] sm:$0xff] %v878_v58  ;;  %v879_v39 = vsel %vm847_vm13, 1.0, %v1136_v38  ;;  %vm848_vm10 = vmand %vm816_vm5, %vm3696_vm7  ;;  %vm3699_vm13 = vnez %v3579_v35  ;;  %vm823_vm7 = vcmp.eq.s32.totalorder %v1415_v9, %v797_v19  ;;  %v3707_v35 = vld [vmem:[#allocation34_spill] sm:$0xff] }
  0xfc   :  { %911 = vst [vmem:[%s3231_s4 + $0x88] sm:$0xff] %v879_v39  ;;  %v880_v52 = vsel %vm848_vm10, 1.0, %v1136_v38  ;;  %vm849_vm3 = vmand %vm817_vm4, %vm3698_vm11  ;;  %vm822_vm4 = vcmp.eq.s32.totalorder %v1412_v8, %v797_v19  ;;  %vm825_vm11 = vcmp.eq.s32.totalorder %v1430_v15, %v797_v19 }
  0xfd   :  { %912 = vst [vmem:[%s3231_s4 + $0x90] sm:$0xff] %v880_v52  ;;  %v881_v27 = vsel %vm849_vm3, 1.0, %v1136_v38  ;;  %vm850_vm5 = vmand %vm818_vm12, %vm3699_vm13  ;;  %vm826_vm3 = vcmp.eq.s32.totalorder %v1433_v17, %v797_v19  ;;  %vm827_vm13 = vcmp.eq.s32.totalorder %v1439_v20, %v797_v19 }
  0xfe   :  { %913 = vst [vmem:[%s3231_s4 + $0x98] sm:$0xff] %v881_v27  ;;  %v882_v51 = vsel %vm850_vm5, 1.0, %v1136_v38  ;;  %vm851_vm10 = vmand %vm819_vm6, %vm2563_vm1  ;;  %vm824_vm6 = vcmp.eq.s32.totalorder %v1427_v14, %v797_v19 }
  0xff   :  { %914 = vst [vmem:[%s3231_s4 + $0xa0] sm:$0xff] %v882_v51  ;;  %v883_v54 = vsel %vm851_vm10, 1.0, %v1136_v38  ;;  %vm852_vm12 = vmand %vm820_vm2, %vm2580_vm14  ;;  %vm3706_vm10 = vnez %v3705_v34 }
 0x100   :  { %915 = vst [vmem:[%s3231_s4 + $0xa8] sm:$0xff] %v883_v54  ;;  %v884_v30 = vsel %vm852_vm12, 1.0, %v1136_v38  ;;  %vm853_vm1 = vmand %vm821_vm9, %vm2596_vm8  ;;  %vm828_vm9 = vcmp.eq.s32.totalorder %v1447_v25, %v797_v19  ;;  %vm829_vm12 = vcmp.eq.s32.totalorder %v1464_v31, %v797_v19 }
 0x101   :  { %916 = vst [vmem:[%s3231_s4 + $0xb0] sm:$0xff] %v884_v30  ;;  %v885_v8 = vsel %vm853_vm1, 1.0, %v1136_v38  ;;  %vm854_vm14 = vmand %vm822_vm4, %vm2613_vm15  ;;  %vm3702_vm15 = vnez %v3701_v5 }
 0x102   :  { %917 = vst [vmem:[%s3231_s4 + $0xb8] sm:$0xff] %v885_v8  ;;  %v886_v9 = vsel %vm854_vm14, 1.0, %v1136_v38  ;;  %vm855_vm8 = vmand %vm823_vm7, %vm2630_vm0  ;;  %vm3704_vm0 = vnez %v3703_v42  ;;  %vm3708_vm7 = vnez %v3707_v35 }
 0x103   :  { %918 = vst [vmem:[%s3231_s4 + $0xc0] sm:$0xff] %v886_v9  ;;  %v887_v14 = vsel %vm855_vm8, 1.0, %v1136_v38  ;;  %vm856_vm2 = vmand %vm824_vm6, %vm3702_vm15  ;;  %vm3710_vm6 = vnez %v3709_v37 }
 0x104   :  { %919 = vst [vmem:[%s3231_s4 + $0xc8] sm:$0xff] %v887_v14  ;;  %v888_v15 = vsel %vm856_vm2, 1.0, %v1136_v38  ;;  %vm857_vm5 = vmand %vm825_vm11, %vm3704_vm0  ;;  %vm3711_vm11 = vnez %v3624_v59 }
 0x105   :  { %920 = vst [vmem:[%s3231_s4 + $0xd0] sm:$0xff] %v888_v15  ;;  %v889_v17 = vsel %vm857_vm5, 1.0, %v1136_v38  ;;  %vm858_vm4 = vmand %vm826_vm3, %vm3706_vm10 }
 0x106   :  { %921 = vst [vmem:[%s3231_s4 + $0xd8] sm:$0xff] %v889_v17  ;;  %v890_v20 = vsel %vm858_vm4, 1.0, %v1136_v38  ;;  %vm859_vm1 = vmand %vm827_vm13, %vm3708_vm7 }
 0x107   :  { %922 = vst [vmem:[%s3231_s4 + $0xe0] sm:$0xff] %v890_v20  ;;  %v891_v25 = vsel %vm859_vm1, 1.0, %v1136_v38  ;;  %vm860_vm14 = vmand %vm828_vm9, %vm3710_vm6 }
 0x108   :  { %923 = vst [vmem:[%s3231_s4 + $0xe8] sm:$0xff] %v891_v25  ;;  %v892_v31 = vsel %vm860_vm14, 1.0, %v1136_v38  ;;  %vm861_vm8 = vmand %vm829_vm12, %vm3711_vm11 }
 0x109   :  { %924 = vst [vmem:[%s3231_s4 + $0xf0] sm:$0xff] %v892_v31  ;;  %v893_v4 = vsel %vm861_vm8, 1.0, %v1136_v38 }
 0x10a   :  { %925 = vst [vmem:[%s3231_s4 + $0xf8] sm:$0xff] %v893_v4 }
 0x10b   :  { %1130 = dma.done.wait [#allocation5], 32  }
 0x10c   :  { %1131 = vsyncadd [#allocation5], 4294967264 }
 0x10d   :  { %957 = vsyncpa [#allocation5], 1 }

</bundles_post_ra>
